<compile_context>
chip_gen: v7x
topology: tpu7x:2x2x1
jax: 0.10.0
libtpu: 0.0.40
codegen_flags: <defaults>
</compile_context>

<pallas_src>
import numpy as np
import jax
import jax.numpy as jnp
from jax.experimental import pallas as pl
from jax.experimental.pallas import tpu as pltpu

BN_EPS = 1e-5
_POOL_W = 7     # pool windows only ever touch input rows/cols 0..6
_SUB = 16       # bf16 sublane packing -> keep batch tiles multiples of 16


def _round_up(v, m):
    return (v + m - 1) // m * m


def _vmem_capacity_bytes():
    try:
        return int(pltpu.get_tpu_info().vmem_capacity_bytes)
    except Exception:
        return 64 << 20   # v7x-sized conservative fallback


# ------------------------------ fused kernel -------------------------------- #

def _aux_head_kernel(x_ref, w1s_ref, shift_ref, w2_ref, wc_ref, b_ref, o_ref):
    """
    x_ref : (49, B_T, C) bf16  spatial (7x7 row-major) leading, batch on sublanes, C on lanes
    w1s   : (C, 128)  bf16     conv1 weight with BN scale and 1/25 pool mean folded in
    shift : (1, 128)  f32      folded BN shift
    w2    : (512, 768) bf16    conv2 weight, K = (kh, kw, ic) row-major
    wc    : (768, NCp) bf16    classifier weight, class dim padded to a multiple of 128
    b     : (1, NCp)  f32      classifier bias (padded)
    o_ref : (B_T, NCp) f32
    """
    bt = o_ref.shape[0]

    def relu_row(r, c):
        # Upcast at load: accumulate the pool sums in f32 (v5e has no bf16 VALU).
        return jnp.maximum(x_ref[r * _POOL_W + c].astype(jnp.float32), 0.0)   # (B_T, C)

    # ReLU + AvgPool2d(5, stride=2): the two pool rows share input rows 2..4 and the
    # two pool cols share input cols 2..4 -> shared vertical/horizontal partial sums.
    mid = [relu_row(2, c) + relu_row(3, c) + relu_row(4, c) for c in range(7)]
    top = [mid[c] + relu_row(0, c) + relu_row(1, c) for c in range(7)]
    bot = [mid[c] + relu_row(5, c) + relu_row(6, c) for c in range(7)]

    def hsums(v):
        m = v[2] + v[3] + v[4]                       # shared cols 2..4
        return m + v[0] + v[1], m + v[5] + v[6]

    p00, p01 = hsums(top)        # pooled windows (oh, ow) = (0,0), (0,1)
    p10, p11 = hsums(bot)        #                          (1,0), (1,1)

    # conv1(1x1) + folded BN + ReLU: batch the four windows along M -> one MXU pass
    # (helps most when K = C is tiny).  The 1/25 pool mean is folded into w1s.
    pooled = jnp.concatenate([p00, p01, p10, p11], axis=0)                 # (4*B_T, C) f32 sums
    h1 = jnp.dot(pooled.astype(jnp.bfloat16), w1s_ref[...],
                 preferred_element_type=jnp.float32)                       # (4*B_T, 128)
    h1 = jnp.maximum(h1 + shift_ref[...], 0.0).astype(jnp.bfloat16)

    # conv2(2x2, 128->768): one K=512 dot over the lane-concatenated windows.
    # Window p = kh*2 + kw occupies lanes [p*128, (p+1)*128), matching w2's K layout.
    h1_cat = jnp.concatenate([h1[p * bt:(p + 1) * bt, :] for p in range(4)], axis=1)
    h2 = jnp.maximum(jnp.dot(h1_cat, w2_ref[...],
                             preferred_element_type=jnp.float32), 0.0)      # (B_T, 768)

    # Linear(768 -> num_classes), lane-padded class dim -> unmasked stores.
    out = jnp.dot(h2.astype(jnp.bfloat16), wc_ref[...],
                  preferred_element_type=jnp.float32) + b_ref[...]
    o_ref[...] = out.astype(o_ref.dtype)


# --------------------------------- wrapper ---------------------------------- #

def aux_head_forward(x, params):
    """x: (N, C, H, W) float32 NCHW; H, W must give a 2x2 pooled map (7x7 / 8x8)."""
    conv1_w, gamma, beta, r_mean, r_var, conv2_w, fc_w, fc_b = params
    N, C, H, W = x.shape
    assert (H - 5) // 2 + 1 == 2 and (W - 5) // 2 + 1 == 2, \
        "flatten -> Linear(768) implies a 2x2 pooled map (7x7 or 8x8 input)"
    C_mid = conv1_w.shape[0]          # 128
    C_feat = conv2_w.shape[0]         # 768
    num_classes = fc_w.shape[0]
    nc_pad = _round_up(num_classes, 128)

    # ---- fold parameters: BN scale and the 1/25 pool mean go into the conv1 weight ----
    inv_std = gamma / jnp.sqrt(r_var + BN_EPS)
    w1s = ((conv1_w[:, :, 0, 0] * inv_std[:, None]).T * (1.0 / 25.0)).astype(jnp.bfloat16)
    shift = (beta - r_mean * inv_std).reshape(1, C_mid).astype(jnp.float32)
    # conv2 (oc, ic, kh, kw) -> (kh*kw*ic, oc); K order matches the kernel's lane concat.
    w2 = conv2_w.transpose(2, 3, 1, 0).reshape(4 * C_mid, C_feat).astype(jnp.bfloat16)
    wc = jnp.zeros((C_feat, nc_pad), jnp.bfloat16).at[:, :num_classes].set(
        fc_w.T.astype(jnp.bfloat16))
    bc = jnp.zeros((1, nc_pad), jnp.float32).at[:, :num_classes].set(
        fc_b.astype(jnp.float32))

    # ---- batch tile: generation-aware VMEM budget, multiple of 16, <= 256 ----
    per_bt = (2 * 49 * C * 2                    # double-buffered bf16 x tile
              + 24 * C * 4                      # pool partial-sum temporaries (peak live, f32)
              + 4 * C_mid * 6 + 4 * C_mid * 2 + C_feat * 4
              + 3 * nc_pad * 4)                 # double-buffered out tile + f32 result
    weight_bytes = 2 * (C * C_mid * 2 + C_mid * 4 + 4 * C_mid * C_feat * 2
                        + C_feat * nc_pad * 2 + nc_pad * 4)   # default double-buffering
    vmem_cap = _vmem_capacity_bytes()
    budget = vmem_cap // 2                                      # leave half of VMEM as headroom
    bt_cap = max(_SUB, (budget - weight_bytes) // per_bt // _SUB * _SUB)
    B_T = min(256, _round_up(N, _SUB), bt_cap)
    if N > _SUB:                                                # >=2 grid steps (v7x dual-TC)
        B_T = min(B_T, _round_up((N + 1) // 2, _SUB))
    B_T = max(B_T, _SUB)
    N_pad = _round_up(N, B_T)
    vmem_limit = int(min(max(weight_bytes + B_T * per_bt + (8 << 20), 32 << 20),
                         int(vmem_cap * 0.9)))

    # ---- layout: NCHW -> (49, N_pad, C) bf16 (cast BEFORE transpose halves the relayout
    #      traffic; pool windows never read beyond row/col 6) ----
    x_hwnc = jnp.transpose(x[:, :, :7, :7].astype(jnp.bfloat16), (2, 3, 0, 1)).reshape(49, N, C)
    if N_pad != N:
        x_hwnc = jnp.pad(x_hwnc, ((0, 0), (0, N_pad - N), (0, 0)))

    cost = pl.CostEstimate(
        flops=int(2 * N_pad * (4 * C * C_mid + 4 * C_mid * C_feat + C_feat * nc_pad)
                  + 110 * N_pad * C),
        transcendentals=0,
        bytes_accessed=int(49 * N_pad * C * 2 + weight_bytes // 2 + N_pad * nc_pad * 4))

    # TODO(synk): single-buffer the grid-invariant weight operands
    #   (pipeline_mode=pl.Buffered(1)) once verified on the deployed jax version; their
    #   default double buffers are already accounted for in `weight_bytes` above.
    out = pl.pallas_call(
        _aux_head_kernel,
        out_shape=jax.ShapeDtypeStruct((N_pad, nc_pad), jnp.float32),
        grid=(N_pad // B_T,),
        in_specs=[
            pl.BlockSpec((49, B_T, C), lambda b: (0, b, 0)),        # x slab (batch-tiled)
            pl.BlockSpec((C, C_mid), lambda b: (0, 0)),             # conv1 (BN + 1/25 folded)
            pl.BlockSpec((1, C_mid), lambda b: (0, 0)),             # BN shift
            pl.BlockSpec((4 * C_mid, C_feat), lambda b: (0, 0)),    # conv2 (K = 512)
            pl.BlockSpec((C_feat, nc_pad), lambda b: (0, 0)),       # fc weight (lane-padded)
            pl.BlockSpec((1, nc_pad), lambda b: (0, 0)),            # fc bias (lane-padded)
        ],
        out_specs=pl.BlockSpec((B_T, nc_pad), lambda b: (b, 0)),
        compiler_params=pltpu.CompilerParams(
            dimension_semantics=("parallel",),
            vmem_limit_bytes=vmem_limit),
        cost_estimate=cost,
    )(x_hwnc, w1s, shift, w2, wc, bc)

    return out[:N, :num_classes]


# --------------------------- pure-JAX reference ------------------------------ #

def ref_forward(x, params):
    conv1_w, gamma, beta, r_mean, r_var, conv2_w, fc_w, fc_b = params
    x = jnp.maximum(x, 0.0)
    N, C, H, W = x.shape
    OH = (H - 5) // 2 + 1
    OW = (W - 5) // 2 + 1
    pool = jnp.stack(
        [jnp.stack([jnp.mean(x[:, :, i * 2:i * 2 + 5, j * 2:j * 2 + 5], axis=(2, 3))
                    for j in range(OW)], axis=-1) for i in range(OH)], axis=-2)
    h = jnp.einsum('nchw,kc->nkhw', pool, conv1_w[:, :, 0, 0])
    h = (h - r_mean[None, :, None, None]) / jnp.sqrt(r_var[None, :, None, None] + BN_EPS)
    h = h * gamma[None, :, None, None] + beta[None, :, None, None]
    h = jnp.maximum(h, 0.0)
    h2 = jnp.maximum(jnp.einsum('nchw,ochw->no', h, conv2_w), 0.0)
    return h2 @ fc_w.T + fc_b


# ----------------------------------- main ------------------------------------ #

if __name__ == "__main__":
    N, C, H, W = 2, 4, 7, 7          # 7x7 input is what the module's forward implies
    NUM_CLASSES = 10

    key = jax.random.PRNGKey(0)
    kx, k1, k2, k3, k4, k5, k6, k7 = jax.random.split(key, 8)

    x = jax.random.normal(kx, (N, C, H, W), jnp.float32)

    conv1_w = jax.random.normal(k1, (128, C, 1, 1), jnp.float32) * 0.1
    gamma = 1.0 + 0.1 * jax.random.normal(k2, (128,), jnp.float32)
    beta = 0.1 * jax.random.normal(k3, (128,), jnp.float32)
    r_mean = 0.1 * jax.random.normal(k4, (128,), jnp.float32)
    r_var = jax.random.uniform(k5, (128,), jnp.float32, minval=0.5, maxval=1.5)
    conv2_w = jax.random.normal(k6, (768, 128, 2, 2), jnp.float32) * 0.05
    fc_w = jax.random.normal(k7, (NUM_CLASSES, 768), jnp.float32) * 0.05
    fc_b = jnp.arange(NUM_CLASSES, dtype=jnp.float32) * 0.01

    params = (conv1_w, gamma, beta, r_mean, r_var, conv2_w, fc_w, fc_b)

    fwd = jax.jit(aux_head_forward)
    out = jax.block_until_ready(fwd(x, params))
    ref = jax.block_until_ready(ref_forward(x, params))

    assert out.shape == (N, NUM_CLASSES), out.shape
    # x / all matmul operands are bf16 (f32 accumulation) -> looser tolerance than pure f32.
    np.testing.assert_allclose(np.asarray(out), np.asarray(ref), rtol=3e-2, atol=3e-2)
    print("KERNEL_OK")
</pallas_src>

<mosaic_0001>
module attributes {stable_mosaic.version = 11 : i64} {
  func.func @_aux_head_kernel(%arg0: i32, %arg1: memref<49x16x4xbf16, #tpu.memory_space<vmem>>, %arg2: memref<4x128xbf16, #tpu.memory_space<vmem>>, %arg3: memref<1x128xf32, #tpu.memory_space<vmem>>, %arg4: memref<512x768xbf16, #tpu.memory_space<vmem>>, %arg5: memref<768x128xbf16, #tpu.memory_space<vmem>>, %arg6: memref<1x128xf32, #tpu.memory_space<vmem>>, %arg7: memref<16x128xf32, #tpu.memory_space<vmem>>) attributes {dimension_semantics = [#tpu.dimension_semantics<parallel>], iteration_bounds = array<i64: 1>, scalar_prefetch = 0 : i64, scratch_operands = 0 : i64, tpu.core_type = #tpu.core_type<tc>, window_params = [{transform_indices = @transform_0, window_bounds = array<i64: 49, 16, 4>}, {pipeline_mode = #tpu.pipeline_mode<synchronous>, transform_indices = @transform_1, window_bounds = array<i64: 4, 128>}, {pipeline_mode = #tpu.pipeline_mode<synchronous>, transform_indices = @transform_2, window_bounds = array<i64: 1, 128>}, {pipeline_mode = #tpu.pipeline_mode<synchronous>, transform_indices = @transform_3, window_bounds = array<i64: 512, 768>}, {pipeline_mode = #tpu.pipeline_mode<synchronous>, transform_indices = @transform_4, window_bounds = array<i64: 768, 128>}, {pipeline_mode = #tpu.pipeline_mode<synchronous>, transform_indices = @transform_5, window_bounds = array<i64: 1, 128>}, {transform_indices = @transform_6, window_bounds = array<i64: 16, 128>}]} {
    %c14 = arith.constant 14 : index
    %c0 = arith.constant 0 : index
    %c0_0 = arith.constant 0 : index
    %0 = vector.load %arg1[%c14, %c0, %c0_0] : memref<49x16x4xbf16, #tpu.memory_space<vmem>>, vector<1x16x4xbf16>
    %1 = vector.shape_cast %0 : vector<1x16x4xbf16> to vector<16x4xbf16>
    %2 = arith.extf %1 : vector<16x4xbf16> to vector<16x4xf32>
    %cst = arith.constant 0.000000e+00 : f32
    %3 = vector.broadcast %cst : f32 to vector<16x4xf32>
    %4 = arith.maximumf %2, %3 : vector<16x4xf32>
    %c21 = arith.constant 21 : index
    %c0_1 = arith.constant 0 : index
    %c0_2 = arith.constant 0 : index
    %5 = vector.load %arg1[%c21, %c0_1, %c0_2] : memref<49x16x4xbf16, #tpu.memory_space<vmem>>, vector<1x16x4xbf16>
    %6 = vector.shape_cast %5 : vector<1x16x4xbf16> to vector<16x4xbf16>
    %7 = arith.extf %6 : vector<16x4xbf16> to vector<16x4xf32>
    %cst_3 = arith.constant 0.000000e+00 : f32
    %8 = vector.broadcast %cst_3 : f32 to vector<16x4xf32>
    %9 = arith.maximumf %7, %8 : vector<16x4xf32>
    %10 = arith.addf %4, %9 : vector<16x4xf32>
    %c28 = arith.constant 28 : index
    %c0_4 = arith.constant 0 : index
    %c0_5 = arith.constant 0 : index
    %11 = vector.load %arg1[%c28, %c0_4, %c0_5] : memref<49x16x4xbf16, #tpu.memory_space<vmem>>, vector<1x16x4xbf16>
    %12 = vector.shape_cast %11 : vector<1x16x4xbf16> to vector<16x4xbf16>
    %13 = arith.extf %12 : vector<16x4xbf16> to vector<16x4xf32>
    %cst_6 = arith.constant 0.000000e+00 : f32
    %14 = vector.broadcast %cst_6 : f32 to vector<16x4xf32>
    %15 = arith.maximumf %13, %14 : vector<16x4xf32>
    %16 = arith.addf %10, %15 : vector<16x4xf32>
    %c15 = arith.constant 15 : index
    %c0_7 = arith.constant 0 : index
    %c0_8 = arith.constant 0 : index
    %17 = vector.load %arg1[%c15, %c0_7, %c0_8] : memref<49x16x4xbf16, #tpu.memory_space<vmem>>, vector<1x16x4xbf16>
    %18 = vector.shape_cast %17 : vector<1x16x4xbf16> to vector<16x4xbf16>
    %19 = arith.extf %18 : vector<16x4xbf16> to vector<16x4xf32>
    %cst_9 = arith.constant 0.000000e+00 : f32
    %20 = vector.broadcast %cst_9 : f32 to vector<16x4xf32>
    %21 = arith.maximumf %19, %20 : vector<16x4xf32>
    %c22 = arith.constant 22 : index
    %c0_10 = arith.constant 0 : index
    %c0_11 = arith.constant 0 : index
    %22 = vector.load %arg1[%c22, %c0_10, %c0_11] : memref<49x16x4xbf16, #tpu.memory_space<vmem>>, vector<1x16x4xbf16>
    %23 = vector.shape_cast %22 : vector<1x16x4xbf16> to vector<16x4xbf16>
    %24 = arith.extf %23 : vector<16x4xbf16> to vector<16x4xf32>
    %cst_12 = arith.constant 0.000000e+00 : f32
    %25 = vector.broadcast %cst_12 : f32 to vector<16x4xf32>
    %26 = arith.maximumf %24, %25 : vector<16x4xf32>
    %27 = arith.addf %21, %26 : vector<16x4xf32>
    %c29 = arith.constant 29 : index
    %c0_13 = arith.constant 0 : index
    %c0_14 = arith.constant 0 : index
    %28 = vector.load %arg1[%c29, %c0_13, %c0_14] : memref<49x16x4xbf16, #tpu.memory_space<vmem>>, vector<1x16x4xbf16>
    %29 = vector.shape_cast %28 : vector<1x16x4xbf16> to vector<16x4xbf16>
    %30 = arith.extf %29 : vector<16x4xbf16> to vector<16x4xf32>
    %cst_15 = arith.constant 0.000000e+00 : f32
    %31 = vector.broadcast %cst_15 : f32 to vector<16x4xf32>
    %32 = arith.maximumf %30, %31 : vector<16x4xf32>
    %33 = arith.addf %27, %32 : vector<16x4xf32>
    %c16 = arith.constant 16 : index
    %c0_16 = arith.constant 0 : index
    %c0_17 = arith.constant 0 : index
    %34 = vector.load %arg1[%c16, %c0_16, %c0_17] : memref<49x16x4xbf16, #tpu.memory_space<vmem>>, vector<1x16x4xbf16>
    %35 = vector.shape_cast %34 : vector<1x16x4xbf16> to vector<16x4xbf16>
    %36 = arith.extf %35 : vector<16x4xbf16> to vector<16x4xf32>
    %cst_18 = arith.constant 0.000000e+00 : f32
    %37 = vector.broadcast %cst_18 : f32 to vector<16x4xf32>
    %38 = arith.maximumf %36, %37 : vector<16x4xf32>
    %c23 = arith.constant 23 : index
    %c0_19 = arith.constant 0 : index
    %c0_20 = arith.constant 0 : index
    %39 = vector.load %arg1[%c23, %c0_19, %c0_20] : memref<49x16x4xbf16, #tpu.memory_space<vmem>>, vector<1x16x4xbf16>
    %40 = vector.shape_cast %39 : vector<1x16x4xbf16> to vector<16x4xbf16>
    %41 = arith.extf %40 : vector<16x4xbf16> to vector<16x4xf32>
    %cst_21 = arith.constant 0.000000e+00 : f32
    %42 = vector.broadcast %cst_21 : f32 to vector<16x4xf32>
    %43 = arith.maximumf %41, %42 : vector<16x4xf32>
    %44 = arith.addf %38, %43 : vector<16x4xf32>
    %c30 = arith.constant 30 : index
    %c0_22 = arith.constant 0 : index
    %c0_23 = arith.constant 0 : index
    %45 = vector.load %arg1[%c30, %c0_22, %c0_23] : memref<49x16x4xbf16, #tpu.memory_space<vmem>>, vector<1x16x4xbf16>
    %46 = vector.shape_cast %45 : vector<1x16x4xbf16> to vector<16x4xbf16>
    %47 = arith.extf %46 : vector<16x4xbf16> to vector<16x4xf32>
    %cst_24 = arith.constant 0.000000e+00 : f32
    %48 = vector.broadcast %cst_24 : f32 to vector<16x4xf32>
    %49 = arith.maximumf %47, %48 : vector<16x4xf32>
    %50 = arith.addf %44, %49 : vector<16x4xf32>
    %c17 = arith.constant 17 : index
    %c0_25 = arith.constant 0 : index
    %c0_26 = arith.constant 0 : index
    %51 = vector.load %arg1[%c17, %c0_25, %c0_26] : memref<49x16x4xbf16, #tpu.memory_space<vmem>>, vector<1x16x4xbf16>
    %52 = vector.shape_cast %51 : vector<1x16x4xbf16> to vector<16x4xbf16>
    %53 = arith.extf %52 : vector<16x4xbf16> to vector<16x4xf32>
    %cst_27 = arith.constant 0.000000e+00 : f32
    %54 = vector.broadcast %cst_27 : f32 to vector<16x4xf32>
    %55 = arith.maximumf %53, %54 : vector<16x4xf32>
    %c24 = arith.constant 24 : index
    %c0_28 = arith.constant 0 : index
    %c0_29 = arith.constant 0 : index
    %56 = vector.load %arg1[%c24, %c0_28, %c0_29] : memref<49x16x4xbf16, #tpu.memory_space<vmem>>, vector<1x16x4xbf16>
    %57 = vector.shape_cast %56 : vector<1x16x4xbf16> to vector<16x4xbf16>
    %58 = arith.extf %57 : vector<16x4xbf16> to vector<16x4xf32>
    %cst_30 = arith.constant 0.000000e+00 : f32
    %59 = vector.broadcast %cst_30 : f32 to vector<16x4xf32>
    %60 = arith.maximumf %58, %59 : vector<16x4xf32>
    %61 = arith.addf %55, %60 : vector<16x4xf32>
    %c31 = arith.constant 31 : index
    %c0_31 = arith.constant 0 : index
    %c0_32 = arith.constant 0 : index
    %62 = vector.load %arg1[%c31, %c0_31, %c0_32] : memref<49x16x4xbf16, #tpu.memory_space<vmem>>, vector<1x16x4xbf16>
    %63 = vector.shape_cast %62 : vector<1x16x4xbf16> to vector<16x4xbf16>
    %64 = arith.extf %63 : vector<16x4xbf16> to vector<16x4xf32>
    %cst_33 = arith.constant 0.000000e+00 : f32
    %65 = vector.broadcast %cst_33 : f32 to vector<16x4xf32>
    %66 = arith.maximumf %64, %65 : vector<16x4xf32>
    %67 = arith.addf %61, %66 : vector<16x4xf32>
    %c18 = arith.constant 18 : index
    %c0_34 = arith.constant 0 : index
    %c0_35 = arith.constant 0 : index
    %68 = vector.load %arg1[%c18, %c0_34, %c0_35] : memref<49x16x4xbf16, #tpu.memory_space<vmem>>, vector<1x16x4xbf16>
    %69 = vector.shape_cast %68 : vector<1x16x4xbf16> to vector<16x4xbf16>
    %70 = arith.extf %69 : vector<16x4xbf16> to vector<16x4xf32>
    %cst_36 = arith.constant 0.000000e+00 : f32
    %71 = vector.broadcast %cst_36 : f32 to vector<16x4xf32>
    %72 = arith.maximumf %70, %71 : vector<16x4xf32>
    %c25 = arith.constant 25 : index
    %c0_37 = arith.constant 0 : index
    %c0_38 = arith.constant 0 : index
    %73 = vector.load %arg1[%c25, %c0_37, %c0_38] : memref<49x16x4xbf16, #tpu.memory_space<vmem>>, vector<1x16x4xbf16>
    %74 = vector.shape_cast %73 : vector<1x16x4xbf16> to vector<16x4xbf16>
    %75 = arith.extf %74 : vector<16x4xbf16> to vector<16x4xf32>
    %cst_39 = arith.constant 0.000000e+00 : f32
    %76 = vector.broadcast %cst_39 : f32 to vector<16x4xf32>
    %77 = arith.maximumf %75, %76 : vector<16x4xf32>
    %78 = arith.addf %72, %77 : vector<16x4xf32>
    %c32 = arith.constant 32 : index
    %c0_40 = arith.constant 0 : index
    %c0_41 = arith.constant 0 : index
    %79 = vector.load %arg1[%c32, %c0_40, %c0_41] : memref<49x16x4xbf16, #tpu.memory_space<vmem>>, vector<1x16x4xbf16>
    %80 = vector.shape_cast %79 : vector<1x16x4xbf16> to vector<16x4xbf16>
    %81 = arith.extf %80 : vector<16x4xbf16> to vector<16x4xf32>
    %cst_42 = arith.constant 0.000000e+00 : f32
    %82 = vector.broadcast %cst_42 : f32 to vector<16x4xf32>
    %83 = arith.maximumf %81, %82 : vector<16x4xf32>
    %84 = arith.addf %78, %83 : vector<16x4xf32>
    %c19 = arith.constant 19 : index
    %c0_43 = arith.constant 0 : index
    %c0_44 = arith.constant 0 : index
    %85 = vector.load %arg1[%c19, %c0_43, %c0_44] : memref<49x16x4xbf16, #tpu.memory_space<vmem>>, vector<1x16x4xbf16>
    %86 = vector.shape_cast %85 : vector<1x16x4xbf16> to vector<16x4xbf16>
    %87 = arith.extf %86 : vector<16x4xbf16> to vector<16x4xf32>
    %cst_45 = arith.constant 0.000000e+00 : f32
    %88 = vector.broadcast %cst_45 : f32 to vector<16x4xf32>
    %89 = arith.maximumf %87, %88 : vector<16x4xf32>
    %c26 = arith.constant 26 : index
    %c0_46 = arith.constant 0 : index
    %c0_47 = arith.constant 0 : index
    %90 = vector.load %arg1[%c26, %c0_46, %c0_47] : memref<49x16x4xbf16, #tpu.memory_space<vmem>>, vector<1x16x4xbf16>
    %91 = vector.shape_cast %90 : vector<1x16x4xbf16> to vector<16x4xbf16>
    %92 = arith.extf %91 : vector<16x4xbf16> to vector<16x4xf32>
    %cst_48 = arith.constant 0.000000e+00 : f32
    %93 = vector.broadcast %cst_48 : f32 to vector<16x4xf32>
    %94 = arith.maximumf %92, %93 : vector<16x4xf32>
    %95 = arith.addf %89, %94 : vector<16x4xf32>
    %c33 = arith.constant 33 : index
    %c0_49 = arith.constant 0 : index
    %c0_50 = arith.constant 0 : index
    %96 = vector.load %arg1[%c33, %c0_49, %c0_50] : memref<49x16x4xbf16, #tpu.memory_space<vmem>>, vector<1x16x4xbf16>
    %97 = vector.shape_cast %96 : vector<1x16x4xbf16> to vector<16x4xbf16>
    %98 = arith.extf %97 : vector<16x4xbf16> to vector<16x4xf32>
    %cst_51 = arith.constant 0.000000e+00 : f32
    %99 = vector.broadcast %cst_51 : f32 to vector<16x4xf32>
    %100 = arith.maximumf %98, %99 : vector<16x4xf32>
    %101 = arith.addf %95, %100 : vector<16x4xf32>
    %c20 = arith.constant 20 : index
    %c0_52 = arith.constant 0 : index
    %c0_53 = arith.constant 0 : index
    %102 = vector.load %arg1[%c20, %c0_52, %c0_53] : memref<49x16x4xbf16, #tpu.memory_space<vmem>>, vector<1x16x4xbf16>
    %103 = vector.shape_cast %102 : vector<1x16x4xbf16> to vector<16x4xbf16>
    %104 = arith.extf %103 : vector<16x4xbf16> to vector<16x4xf32>
    %cst_54 = arith.constant 0.000000e+00 : f32
    %105 = vector.broadcast %cst_54 : f32 to vector<16x4xf32>
    %106 = arith.maximumf %104, %105 : vector<16x4xf32>
    %c27 = arith.constant 27 : index
    %c0_55 = arith.constant 0 : index
    %c0_56 = arith.constant 0 : index
    %107 = vector.load %arg1[%c27, %c0_55, %c0_56] : memref<49x16x4xbf16, #tpu.memory_space<vmem>>, vector<1x16x4xbf16>
    %108 = vector.shape_cast %107 : vector<1x16x4xbf16> to vector<16x4xbf16>
    %109 = arith.extf %108 : vector<16x4xbf16> to vector<16x4xf32>
    %cst_57 = arith.constant 0.000000e+00 : f32
    %110 = vector.broadcast %cst_57 : f32 to vector<16x4xf32>
    %111 = arith.maximumf %109, %110 : vector<16x4xf32>
    %112 = arith.addf %106, %111 : vector<16x4xf32>
    %c34 = arith.constant 34 : index
    %c0_58 = arith.constant 0 : index
    %c0_59 = arith.constant 0 : index
    %113 = vector.load %arg1[%c34, %c0_58, %c0_59] : memref<49x16x4xbf16, #tpu.memory_space<vmem>>, vector<1x16x4xbf16>
    %114 = vector.shape_cast %113 : vector<1x16x4xbf16> to vector<16x4xbf16>
    %115 = arith.extf %114 : vector<16x4xbf16> to vector<16x4xf32>
    %cst_60 = arith.constant 0.000000e+00 : f32
    %116 = vector.broadcast %cst_60 : f32 to vector<16x4xf32>
    %117 = arith.maximumf %115, %116 : vector<16x4xf32>
    %118 = arith.addf %112, %117 : vector<16x4xf32>
    %c0_61 = arith.constant 0 : index
    %c0_62 = arith.constant 0 : index
    %c0_63 = arith.constant 0 : index
    %119 = vector.load %arg1[%c0_61, %c0_62, %c0_63] : memref<49x16x4xbf16, #tpu.memory_space<vmem>>, vector<1x16x4xbf16>
    %120 = vector.shape_cast %119 : vector<1x16x4xbf16> to vector<16x4xbf16>
    %121 = arith.extf %120 : vector<16x4xbf16> to vector<16x4xf32>
    %cst_64 = arith.constant 0.000000e+00 : f32
    %122 = vector.broadcast %cst_64 : f32 to vector<16x4xf32>
    %123 = arith.maximumf %121, %122 : vector<16x4xf32>
    %124 = arith.addf %16, %123 : vector<16x4xf32>
    %c7 = arith.constant 7 : index
    %c0_65 = arith.constant 0 : index
    %c0_66 = arith.constant 0 : index
    %125 = vector.load %arg1[%c7, %c0_65, %c0_66] : memref<49x16x4xbf16, #tpu.memory_space<vmem>>, vector<1x16x4xbf16>
    %126 = vector.shape_cast %125 : vector<1x16x4xbf16> to vector<16x4xbf16>
    %127 = arith.extf %126 : vector<16x4xbf16> to vector<16x4xf32>
    %cst_67 = arith.constant 0.000000e+00 : f32
    %128 = vector.broadcast %cst_67 : f32 to vector<16x4xf32>
    %129 = arith.maximumf %127, %128 : vector<16x4xf32>
    %130 = arith.addf %124, %129 : vector<16x4xf32>
    %c1 = arith.constant 1 : index
    %c0_68 = arith.constant 0 : index
    %c0_69 = arith.constant 0 : index
    %131 = vector.load %arg1[%c1, %c0_68, %c0_69] : memref<49x16x4xbf16, #tpu.memory_space<vmem>>, vector<1x16x4xbf16>
    %132 = vector.shape_cast %131 : vector<1x16x4xbf16> to vector<16x4xbf16>
    %133 = arith.extf %132 : vector<16x4xbf16> to vector<16x4xf32>
    %cst_70 = arith.constant 0.000000e+00 : f32
    %134 = vector.broadcast %cst_70 : f32 to vector<16x4xf32>
    %135 = arith.maximumf %133, %134 : vector<16x4xf32>
    %136 = arith.addf %33, %135 : vector<16x4xf32>
    %c8 = arith.constant 8 : index
    %c0_71 = arith.constant 0 : index
    %c0_72 = arith.constant 0 : index
    %137 = vector.load %arg1[%c8, %c0_71, %c0_72] : memref<49x16x4xbf16, #tpu.memory_space<vmem>>, vector<1x16x4xbf16>
    %138 = vector.shape_cast %137 : vector<1x16x4xbf16> to vector<16x4xbf16>
    %139 = arith.extf %138 : vector<16x4xbf16> to vector<16x4xf32>
    %cst_73 = arith.constant 0.000000e+00 : f32
    %140 = vector.broadcast %cst_73 : f32 to vector<16x4xf32>
    %141 = arith.maximumf %139, %140 : vector<16x4xf32>
    %142 = arith.addf %136, %141 : vector<16x4xf32>
    %c2 = arith.constant 2 : index
    %c0_74 = arith.constant 0 : index
    %c0_75 = arith.constant 0 : index
    %143 = vector.load %arg1[%c2, %c0_74, %c0_75] : memref<49x16x4xbf16, #tpu.memory_space<vmem>>, vector<1x16x4xbf16>
    %144 = vector.shape_cast %143 : vector<1x16x4xbf16> to vector<16x4xbf16>
    %145 = arith.extf %144 : vector<16x4xbf16> to vector<16x4xf32>
    %cst_76 = arith.constant 0.000000e+00 : f32
    %146 = vector.broadcast %cst_76 : f32 to vector<16x4xf32>
    %147 = arith.maximumf %145, %146 : vector<16x4xf32>
    %148 = arith.addf %50, %147 : vector<16x4xf32>
    %c9 = arith.constant 9 : index
    %c0_77 = arith.constant 0 : index
    %c0_78 = arith.constant 0 : index
    %149 = vector.load %arg1[%c9, %c0_77, %c0_78] : memref<49x16x4xbf16, #tpu.memory_space<vmem>>, vector<1x16x4xbf16>
    %150 = vector.shape_cast %149 : vector<1x16x4xbf16> to vector<16x4xbf16>
    %151 = arith.extf %150 : vector<16x4xbf16> to vector<16x4xf32>
    %cst_79 = arith.constant 0.000000e+00 : f32
    %152 = vector.broadcast %cst_79 : f32 to vector<16x4xf32>
    %153 = arith.maximumf %151, %152 : vector<16x4xf32>
    %154 = arith.addf %148, %153 : vector<16x4xf32>
    %c3 = arith.constant 3 : index
    %c0_80 = arith.constant 0 : index
    %c0_81 = arith.constant 0 : index
    %155 = vector.load %arg1[%c3, %c0_80, %c0_81] : memref<49x16x4xbf16, #tpu.memory_space<vmem>>, vector<1x16x4xbf16>
    %156 = vector.shape_cast %155 : vector<1x16x4xbf16> to vector<16x4xbf16>
    %157 = arith.extf %156 : vector<16x4xbf16> to vector<16x4xf32>
    %cst_82 = arith.constant 0.000000e+00 : f32
    %158 = vector.broadcast %cst_82 : f32 to vector<16x4xf32>
    %159 = arith.maximumf %157, %158 : vector<16x4xf32>
    %160 = arith.addf %67, %159 : vector<16x4xf32>
    %c10 = arith.constant 10 : index
    %c0_83 = arith.constant 0 : index
    %c0_84 = arith.constant 0 : index
    %161 = vector.load %arg1[%c10, %c0_83, %c0_84] : memref<49x16x4xbf16, #tpu.memory_space<vmem>>, vector<1x16x4xbf16>
    %162 = vector.shape_cast %161 : vector<1x16x4xbf16> to vector<16x4xbf16>
    %163 = arith.extf %162 : vector<16x4xbf16> to vector<16x4xf32>
    %cst_85 = arith.constant 0.000000e+00 : f32
    %164 = vector.broadcast %cst_85 : f32 to vector<16x4xf32>
    %165 = arith.maximumf %163, %164 : vector<16x4xf32>
    %166 = arith.addf %160, %165 : vector<16x4xf32>
    %c4 = arith.constant 4 : index
    %c0_86 = arith.constant 0 : index
    %c0_87 = arith.constant 0 : index
    %167 = vector.load %arg1[%c4, %c0_86, %c0_87] : memref<49x16x4xbf16, #tpu.memory_space<vmem>>, vector<1x16x4xbf16>
    %168 = vector.shape_cast %167 : vector<1x16x4xbf16> to vector<16x4xbf16>
    %169 = arith.extf %168 : vector<16x4xbf16> to vector<16x4xf32>
    %cst_88 = arith.constant 0.000000e+00 : f32
    %170 = vector.broadcast %cst_88 : f32 to vector<16x4xf32>
    %171 = arith.maximumf %169, %170 : vector<16x4xf32>
    %172 = arith.addf %84, %171 : vector<16x4xf32>
    %c11 = arith.constant 11 : index
    %c0_89 = arith.constant 0 : index
    %c0_90 = arith.constant 0 : index
    %173 = vector.load %arg1[%c11, %c0_89, %c0_90] : memref<49x16x4xbf16, #tpu.memory_space<vmem>>, vector<1x16x4xbf16>
    %174 = vector.shape_cast %173 : vector<1x16x4xbf16> to vector<16x4xbf16>
    %175 = arith.extf %174 : vector<16x4xbf16> to vector<16x4xf32>
    %cst_91 = arith.constant 0.000000e+00 : f32
    %176 = vector.broadcast %cst_91 : f32 to vector<16x4xf32>
    %177 = arith.maximumf %175, %176 : vector<16x4xf32>
    %178 = arith.addf %172, %177 : vector<16x4xf32>
    %c5 = arith.constant 5 : index
    %c0_92 = arith.constant 0 : index
    %c0_93 = arith.constant 0 : index
    %179 = vector.load %arg1[%c5, %c0_92, %c0_93] : memref<49x16x4xbf16, #tpu.memory_space<vmem>>, vector<1x16x4xbf16>
    %180 = vector.shape_cast %179 : vector<1x16x4xbf16> to vector<16x4xbf16>
    %181 = arith.extf %180 : vector<16x4xbf16> to vector<16x4xf32>
    %cst_94 = arith.constant 0.000000e+00 : f32
    %182 = vector.broadcast %cst_94 : f32 to vector<16x4xf32>
    %183 = arith.maximumf %181, %182 : vector<16x4xf32>
    %184 = arith.addf %101, %183 : vector<16x4xf32>
    %c12 = arith.constant 12 : index
    %c0_95 = arith.constant 0 : index
    %c0_96 = arith.constant 0 : index
    %185 = vector.load %arg1[%c12, %c0_95, %c0_96] : memref<49x16x4xbf16, #tpu.memory_space<vmem>>, vector<1x16x4xbf16>
    %186 = vector.shape_cast %185 : vector<1x16x4xbf16> to vector<16x4xbf16>
    %187 = arith.extf %186 : vector<16x4xbf16> to vector<16x4xf32>
    %cst_97 = arith.constant 0.000000e+00 : f32
    %188 = vector.broadcast %cst_97 : f32 to vector<16x4xf32>
    %189 = arith.maximumf %187, %188 : vector<16x4xf32>
    %190 = arith.addf %184, %189 : vector<16x4xf32>
    %c6 = arith.constant 6 : index
    %c0_98 = arith.constant 0 : index
    %c0_99 = arith.constant 0 : index
    %191 = vector.load %arg1[%c6, %c0_98, %c0_99] : memref<49x16x4xbf16, #tpu.memory_space<vmem>>, vector<1x16x4xbf16>
    %192 = vector.shape_cast %191 : vector<1x16x4xbf16> to vector<16x4xbf16>
    %193 = arith.extf %192 : vector<16x4xbf16> to vector<16x4xf32>
    %cst_100 = arith.constant 0.000000e+00 : f32
    %194 = vector.broadcast %cst_100 : f32 to vector<16x4xf32>
    %195 = arith.maximumf %193, %194 : vector<16x4xf32>
    %196 = arith.addf %118, %195 : vector<16x4xf32>
    %c13 = arith.constant 13 : index
    %c0_101 = arith.constant 0 : index
    %c0_102 = arith.constant 0 : index
    %197 = vector.load %arg1[%c13, %c0_101, %c0_102] : memref<49x16x4xbf16, #tpu.memory_space<vmem>>, vector<1x16x4xbf16>
    %198 = vector.shape_cast %197 : vector<1x16x4xbf16> to vector<16x4xbf16>
    %199 = arith.extf %198 : vector<16x4xbf16> to vector<16x4xf32>
    %cst_103 = arith.constant 0.000000e+00 : f32
    %200 = vector.broadcast %cst_103 : f32 to vector<16x4xf32>
    %201 = arith.maximumf %199, %200 : vector<16x4xf32>
    %202 = arith.addf %196, %201 : vector<16x4xf32>
    %c35 = arith.constant 35 : index
    %c0_104 = arith.constant 0 : index
    %c0_105 = arith.constant 0 : index
    %203 = vector.load %arg1[%c35, %c0_104, %c0_105] : memref<49x16x4xbf16, #tpu.memory_space<vmem>>, vector<1x16x4xbf16>
    %204 = vector.shape_cast %203 : vector<1x16x4xbf16> to vector<16x4xbf16>
    %205 = arith.extf %204 : vector<16x4xbf16> to vector<16x4xf32>
    %cst_106 = arith.constant 0.000000e+00 : f32
    %206 = vector.broadcast %cst_106 : f32 to vector<16x4xf32>
    %207 = arith.maximumf %205, %206 : vector<16x4xf32>
    %208 = arith.addf %16, %207 : vector<16x4xf32>
    %c42 = arith.constant 42 : index
    %c0_107 = arith.constant 0 : index
    %c0_108 = arith.constant 0 : index
    %209 = vector.load %arg1[%c42, %c0_107, %c0_108] : memref<49x16x4xbf16, #tpu.memory_space<vmem>>, vector<1x16x4xbf16>
    %210 = vector.shape_cast %209 : vector<1x16x4xbf16> to vector<16x4xbf16>
    %211 = arith.extf %210 : vector<16x4xbf16> to vector<16x4xf32>
    %cst_109 = arith.constant 0.000000e+00 : f32
    %212 = vector.broadcast %cst_109 : f32 to vector<16x4xf32>
    %213 = arith.maximumf %211, %212 : vector<16x4xf32>
    %214 = arith.addf %208, %213 : vector<16x4xf32>
    %c36 = arith.constant 36 : index
    %c0_110 = arith.constant 0 : index
    %c0_111 = arith.constant 0 : index
    %215 = vector.load %arg1[%c36, %c0_110, %c0_111] : memref<49x16x4xbf16, #tpu.memory_space<vmem>>, vector<1x16x4xbf16>
    %216 = vector.shape_cast %215 : vector<1x16x4xbf16> to vector<16x4xbf16>
    %217 = arith.extf %216 : vector<16x4xbf16> to vector<16x4xf32>
    %cst_112 = arith.constant 0.000000e+00 : f32
    %218 = vector.broadcast %cst_112 : f32 to vector<16x4xf32>
    %219 = arith.maximumf %217, %218 : vector<16x4xf32>
    %220 = arith.addf %33, %219 : vector<16x4xf32>
    %c43 = arith.constant 43 : index
    %c0_113 = arith.constant 0 : index
    %c0_114 = arith.constant 0 : index
    %221 = vector.load %arg1[%c43, %c0_113, %c0_114] : memref<49x16x4xbf16, #tpu.memory_space<vmem>>, vector<1x16x4xbf16>
    %222 = vector.shape_cast %221 : vector<1x16x4xbf16> to vector<16x4xbf16>
    %223 = arith.extf %222 : vector<16x4xbf16> to vector<16x4xf32>
    %cst_115 = arith.constant 0.000000e+00 : f32
    %224 = vector.broadcast %cst_115 : f32 to vector<16x4xf32>
    %225 = arith.maximumf %223, %224 : vector<16x4xf32>
    %226 = arith.addf %220, %225 : vector<16x4xf32>
    %c37 = arith.constant 37 : index
    %c0_116 = arith.constant 0 : index
    %c0_117 = arith.constant 0 : index
    %227 = vector.load %arg1[%c37, %c0_116, %c0_117] : memref<49x16x4xbf16, #tpu.memory_space<vmem>>, vector<1x16x4xbf16>
    %228 = vector.shape_cast %227 : vector<1x16x4xbf16> to vector<16x4xbf16>
    %229 = arith.extf %228 : vector<16x4xbf16> to vector<16x4xf32>
    %cst_118 = arith.constant 0.000000e+00 : f32
    %230 = vector.broadcast %cst_118 : f32 to vector<16x4xf32>
    %231 = arith.maximumf %229, %230 : vector<16x4xf32>
    %232 = arith.addf %50, %231 : vector<16x4xf32>
    %c44 = arith.constant 44 : index
    %c0_119 = arith.constant 0 : index
    %c0_120 = arith.constant 0 : index
    %233 = vector.load %arg1[%c44, %c0_119, %c0_120] : memref<49x16x4xbf16, #tpu.memory_space<vmem>>, vector<1x16x4xbf16>
    %234 = vector.shape_cast %233 : vector<1x16x4xbf16> to vector<16x4xbf16>
    %235 = arith.extf %234 : vector<16x4xbf16> to vector<16x4xf32>
    %cst_121 = arith.constant 0.000000e+00 : f32
    %236 = vector.broadcast %cst_121 : f32 to vector<16x4xf32>
    %237 = arith.maximumf %235, %236 : vector<16x4xf32>
    %238 = arith.addf %232, %237 : vector<16x4xf32>
    %c38 = arith.constant 38 : index
    %c0_122 = arith.constant 0 : index
    %c0_123 = arith.constant 0 : index
    %239 = vector.load %arg1[%c38, %c0_122, %c0_123] : memref<49x16x4xbf16, #tpu.memory_space<vmem>>, vector<1x16x4xbf16>
    %240 = vector.shape_cast %239 : vector<1x16x4xbf16> to vector<16x4xbf16>
    %241 = arith.extf %240 : vector<16x4xbf16> to vector<16x4xf32>
    %cst_124 = arith.constant 0.000000e+00 : f32
    %242 = vector.broadcast %cst_124 : f32 to vector<16x4xf32>
    %243 = arith.maximumf %241, %242 : vector<16x4xf32>
    %244 = arith.addf %67, %243 : vector<16x4xf32>
    %c45 = arith.constant 45 : index
    %c0_125 = arith.constant 0 : index
    %c0_126 = arith.constant 0 : index
    %245 = vector.load %arg1[%c45, %c0_125, %c0_126] : memref<49x16x4xbf16, #tpu.memory_space<vmem>>, vector<1x16x4xbf16>
    %246 = vector.shape_cast %245 : vector<1x16x4xbf16> to vector<16x4xbf16>
    %247 = arith.extf %246 : vector<16x4xbf16> to vector<16x4xf32>
    %cst_127 = arith.constant 0.000000e+00 : f32
    %248 = vector.broadcast %cst_127 : f32 to vector<16x4xf32>
    %249 = arith.maximumf %247, %248 : vector<16x4xf32>
    %250 = arith.addf %244, %249 : vector<16x4xf32>
    %c39 = arith.constant 39 : index
    %c0_128 = arith.constant 0 : index
    %c0_129 = arith.constant 0 : index
    %251 = vector.load %arg1[%c39, %c0_128, %c0_129] : memref<49x16x4xbf16, #tpu.memory_space<vmem>>, vector<1x16x4xbf16>
    %252 = vector.shape_cast %251 : vector<1x16x4xbf16> to vector<16x4xbf16>
    %253 = arith.extf %252 : vector<16x4xbf16> to vector<16x4xf32>
    %cst_130 = arith.constant 0.000000e+00 : f32
    %254 = vector.broadcast %cst_130 : f32 to vector<16x4xf32>
    %255 = arith.maximumf %253, %254 : vector<16x4xf32>
    %256 = arith.addf %84, %255 : vector<16x4xf32>
    %c46 = arith.constant 46 : index
    %c0_131 = arith.constant 0 : index
    %c0_132 = arith.constant 0 : index
    %257 = vector.load %arg1[%c46, %c0_131, %c0_132] : memref<49x16x4xbf16, #tpu.memory_space<vmem>>, vector<1x16x4xbf16>
    %258 = vector.shape_cast %257 : vector<1x16x4xbf16> to vector<16x4xbf16>
    %259 = arith.extf %258 : vector<16x4xbf16> to vector<16x4xf32>
    %cst_133 = arith.constant 0.000000e+00 : f32
    %260 = vector.broadcast %cst_133 : f32 to vector<16x4xf32>
    %261 = arith.maximumf %259, %260 : vector<16x4xf32>
    %262 = arith.addf %256, %261 : vector<16x4xf32>
    %c40 = arith.constant 40 : index
    %c0_134 = arith.constant 0 : index
    %c0_135 = arith.constant 0 : index
    %263 = vector.load %arg1[%c40, %c0_134, %c0_135] : memref<49x16x4xbf16, #tpu.memory_space<vmem>>, vector<1x16x4xbf16>
    %264 = vector.shape_cast %263 : vector<1x16x4xbf16> to vector<16x4xbf16>
    %265 = arith.extf %264 : vector<16x4xbf16> to vector<16x4xf32>
    %cst_136 = arith.constant 0.000000e+00 : f32
    %266 = vector.broadcast %cst_136 : f32 to vector<16x4xf32>
    %267 = arith.maximumf %265, %266 : vector<16x4xf32>
    %268 = arith.addf %101, %267 : vector<16x4xf32>
    %c47 = arith.constant 47 : index
    %c0_137 = arith.constant 0 : index
    %c0_138 = arith.constant 0 : index
    %269 = vector.load %arg1[%c47, %c0_137, %c0_138] : memref<49x16x4xbf16, #tpu.memory_space<vmem>>, vector<1x16x4xbf16>
    %270 = vector.shape_cast %269 : vector<1x16x4xbf16> to vector<16x4xbf16>
    %271 = arith.extf %270 : vector<16x4xbf16> to vector<16x4xf32>
    %cst_139 = arith.constant 0.000000e+00 : f32
    %272 = vector.broadcast %cst_139 : f32 to vector<16x4xf32>
    %273 = arith.maximumf %271, %272 : vector<16x4xf32>
    %274 = arith.addf %268, %273 : vector<16x4xf32>
    %c41 = arith.constant 41 : index
    %c0_140 = arith.constant 0 : index
    %c0_141 = arith.constant 0 : index
    %275 = vector.load %arg1[%c41, %c0_140, %c0_141] : memref<49x16x4xbf16, #tpu.memory_space<vmem>>, vector<1x16x4xbf16>
    %276 = vector.shape_cast %275 : vector<1x16x4xbf16> to vector<16x4xbf16>
    %277 = arith.extf %276 : vector<16x4xbf16> to vector<16x4xf32>
    %cst_142 = arith.constant 0.000000e+00 : f32
    %278 = vector.broadcast %cst_142 : f32 to vector<16x4xf32>
    %279 = arith.maximumf %277, %278 : vector<16x4xf32>
    %280 = arith.addf %118, %279 : vector<16x4xf32>
    %c48 = arith.constant 48 : index
    %c0_143 = arith.constant 0 : index
    %c0_144 = arith.constant 0 : index
    %281 = vector.load %arg1[%c48, %c0_143, %c0_144] : memref<49x16x4xbf16, #tpu.memory_space<vmem>>, vector<1x16x4xbf16>
    %282 = vector.shape_cast %281 : vector<1x16x4xbf16> to vector<16x4xbf16>
    %283 = arith.extf %282 : vector<16x4xbf16> to vector<16x4xf32>
    %cst_145 = arith.constant 0.000000e+00 : f32
    %284 = vector.broadcast %cst_145 : f32 to vector<16x4xf32>
    %285 = arith.maximumf %283, %284 : vector<16x4xf32>
    %286 = arith.addf %280, %285 : vector<16x4xf32>
    %287 = arith.addf %154, %166 : vector<16x4xf32>
    %288 = arith.addf %287, %178 : vector<16x4xf32>
    %289 = arith.addf %288, %130 : vector<16x4xf32>
    %290 = arith.addf %289, %142 : vector<16x4xf32>
    %291 = arith.addf %288, %190 : vector<16x4xf32>
    %292 = arith.addf %291, %202 : vector<16x4xf32>
    %293 = arith.addf %238, %250 : vector<16x4xf32>
    %294 = arith.addf %293, %262 : vector<16x4xf32>
    %295 = arith.addf %294, %214 : vector<16x4xf32>
    %296 = arith.addf %295, %226 : vector<16x4xf32>
    %297 = arith.addf %294, %274 : vector<16x4xf32>
    %298 = arith.addf %297, %286 : vector<16x4xf32>
    %299 = tpu.concatenate %290, %292, %296, %298 in 0 : vector<16x4xf32>, vector<16x4xf32>, vector<16x4xf32>, vector<16x4xf32> -> vector<64x4xf32>
    %300 = arith.truncf %299 : vector<64x4xf32> to vector<64x4xbf16>
    %c0_146 = arith.constant 0 : index
    %c0_147 = arith.constant 0 : index
    %301 = vector.load %arg2[%c0_146, %c0_147] : memref<4x128xbf16, #tpu.memory_space<vmem>>, vector<4x128xbf16>
    %cst_148 = arith.constant dense<0.000000e+00> : vector<64x128xf32>
    %302 = tpu.matmul %300, %301, %cst_148 {dimension_numbers = #tpu.dot_dimension_numbers<[1], [0], [0], [1], [0, 0, 1, 1], [], []>} : vector<64x4xbf16>, vector<4x128xbf16>, vector<64x128xf32> -> vector<64x128xf32>
    %c0_149 = arith.constant 0 : index
    %c0_150 = arith.constant 0 : index
    %303 = vector.load %arg3[%c0_149, %c0_150] : memref<1x128xf32, #tpu.memory_space<vmem>>, vector<1x128xf32>
    %304 = vector.broadcast %303 : vector<1x128xf32> to vector<64x128xf32>
    %305 = arith.addf %302, %304 : vector<64x128xf32>
    %cst_151 = arith.constant 0.000000e+00 : f32
    %306 = vector.broadcast %cst_151 : f32 to vector<64x128xf32>
    %307 = arith.maximumf %305, %306 : vector<64x128xf32>
    %308 = arith.truncf %307 : vector<64x128xf32> to vector<64x128xbf16>
    %309 = vector.extract_strided_slice %308 {offsets = [0, 0], sizes = [16, 128], strides = [1, 1]} : vector<64x128xbf16> to vector<16x128xbf16>
    %310 = vector.extract_strided_slice %308 {offsets = [16, 0], sizes = [16, 128], strides = [1, 1]} : vector<64x128xbf16> to vector<16x128xbf16>
    %311 = vector.extract_strided_slice %308 {offsets = [32, 0], sizes = [16, 128], strides = [1, 1]} : vector<64x128xbf16> to vector<16x128xbf16>
    %312 = vector.extract_strided_slice %308 {offsets = [48, 0], sizes = [16, 128], strides = [1, 1]} : vector<64x128xbf16> to vector<16x128xbf16>
    %313 = tpu.concatenate %309, %310, %311, %312 in 1 : vector<16x128xbf16>, vector<16x128xbf16>, vector<16x128xbf16>, vector<16x128xbf16> -> vector<16x512xbf16>
    %c0_152 = arith.constant 0 : index
    %c0_153 = arith.constant 0 : index
    %314 = vector.load %arg4[%c0_152, %c0_153] : memref<512x768xbf16, #tpu.memory_space<vmem>>, vector<512x768xbf16>
    %cst_154 = arith.constant dense<0.000000e+00> : vector<16x768xf32>
    %315 = tpu.matmul %313, %314, %cst_154 {dimension_numbers = #tpu.dot_dimension_numbers<[1], [0], [0], [1], [0, 0, 1, 1], [], []>} : vector<16x512xbf16>, vector<512x768xbf16>, vector<16x768xf32> -> vector<16x768xf32>
    %cst_155 = arith.constant 0.000000e+00 : f32
    %316 = vector.broadcast %cst_155 : f32 to vector<16x768xf32>
    %317 = arith.maximumf %315, %316 : vector<16x768xf32>
    %318 = arith.truncf %317 : vector<16x768xf32> to vector<16x768xbf16>
    %c0_156 = arith.constant 0 : index
    %c0_157 = arith.constant 0 : index
    %319 = vector.load %arg5[%c0_156, %c0_157] : memref<768x128xbf16, #tpu.memory_space<vmem>>, vector<768x128xbf16>
    %cst_158 = arith.constant dense<0.000000e+00> : vector<16x128xf32>
    %320 = tpu.matmul %318, %319, %cst_158 {dimension_numbers = #tpu.dot_dimension_numbers<[1], [0], [0], [1], [0, 0, 1, 1], [], []>} : vector<16x768xbf16>, vector<768x128xbf16>, vector<16x128xf32> -> vector<16x128xf32>
    %c0_159 = arith.constant 0 : index
    %c0_160 = arith.constant 0 : index
    %321 = vector.load %arg6[%c0_159, %c0_160] : memref<1x128xf32, #tpu.memory_space<vmem>>, vector<1x128xf32>
    %322 = vector.broadcast %321 : vector<1x128xf32> to vector<16x128xf32>
    %323 = arith.addf %320, %322 : vector<16x128xf32>
    %c0_161 = arith.constant 0 : index
    %c0_162 = arith.constant 0 : index
    %324 = vector.load %arg7[%c0_161, %c0_162] : memref<16x128xf32, #tpu.memory_space<vmem>>, vector<16x128xf32>
    tpu.vector_store %arg7[%c0_161, %c0_162], %323 {strides = array<i32>} : memref<16x128xf32, #tpu.memory_space<vmem>>, vector<16x128xf32>,
    return
  }
  func.func @transform_0(%arg0: i32) -> (i32, i32, i32) {
    %c0_i32 = arith.constant 0 : i32
    %c0_i32_0 = arith.constant 0 : i32
    %c0_i32_1 = arith.constant 0 : i32
    return %c0_i32, %arg0, %c0_i32_0 : i32, i32, i32
  }
  func.func @transform_1(%arg0: i32) -> (i32, i32) {
    %c0_i32 = arith.constant 0 : i32
    %c0_i32_0 = arith.constant 0 : i32
    %c0_i32_1 = arith.constant 0 : i32
    return %c0_i32, %c0_i32_0 : i32, i32
  }
  func.func @transform_2(%arg0: i32) -> (i32, i32) {
    %c0_i32 = arith.constant 0 : i32
    %c0_i32_0 = arith.constant 0 : i32
    %c0_i32_1 = arith.constant 0 : i32
    return %c0_i32, %c0_i32_0 : i32, i32
  }
  func.func @transform_3(%arg0: i32) -> (i32, i32) {
    %c0_i32 = arith.constant 0 : i32
    %c0_i32_0 = arith.constant 0 : i32
    %c0_i32_1 = arith.constant 0 : i32
    return %c0_i32, %c0_i32_0 : i32, i32
  }
  func.func @transform_4(%arg0: i32) -> (i32, i32) {
    %c0_i32 = arith.constant 0 : i32
    %c0_i32_0 = arith.constant 0 : i32
    %c0_i32_1 = arith.constant 0 : i32
    return %c0_i32, %c0_i32_0 : i32, i32
  }
  func.func @transform_5(%arg0: i32) -> (i32, i32) {
    %c0_i32 = arith.constant 0 : i32
    %c0_i32_0 = arith.constant 0 : i32
    %c0_i32_1 = arith.constant 0 : i32
    return %c0_i32, %c0_i32_0 : i32, i32
  }
  func.func @transform_6(%arg0: i32) -> (i32, i32) {
    %c0_i32 = arith.constant 0 : i32
    %c0_i32_0 = arith.constant 0 : i32
    return %arg0, %c0_i32 : i32, i32
  }
}

</mosaic_0001>

<bundles_post_ra>
// kernel: aux_head_forward.1
= control target key start
LH: loop header
LB: loop body
LE: loop exit
PB: predicated region body
PF: predicated region fallthrough
CT: control target
= control target key end

     0   :  { %vm499_vm0 = vcmask 1041408   ;;  %vm486_vm1 = vcmask 31744   ;;  %s4610_s1 = inlined_call_operand.vmem [shape: bf16[4,128], index: 1, kind: input, shape index: {}]   ;;  %s4611_s0 = inlined_call_operand.vmem [shape: bf16[49,16,4], index: 0, kind: input, shape index: {}]   ;;  %s4612_s3 = inlined_call_operand.vmem [shape: bf16[512,768], index: 3, kind: input, shape index: {}]   ;;  %s4613_s2 = inlined_call_operand.vmem [shape: f32[1,128], index: 2, kind: input, shape index: {}]   ;;  %s4614_s4 = inlined_call_operand.vmem [shape: bf16[768,128], index: 4, kind: input, shape index: {}]   ;;  %s4615_s5 = inlined_call_operand.vmem [shape: f32[1,128], index: 5, kind: input, shape index: {}]   ;;  %s4616_s6 = inlined_call_operand.vmem [shape: f32[16,128], index: 6, kind: output, shape index: {}]  }
   0x1   :  { %v478_v0 = vld [vmem:[%s4610_s1] sm:$0x3]  ;;  %v3066_v1 = vld [vmem:[%s4611_s0 + $0x70] sm:$0xff]   ;;  %v3067_v2 = vld [vmem:[%s4611_s0 + $0xa8] sm:$0xff]  }
   0x2   :  { %3207 = vmatprep.subr.msk.bf16.mxu0 %vm499_vm0, %v478_v0  ;;  %v501_v3 = vsel %vm499_vm0, %v478_v0, 0  ;;  %v2872_v4 = vunpack.c.l.bf16 %v3066_v1  ;;  %v2873_v5 = vunpack.c.h.bf16 %v3066_v1  ;;  %v2876_v6 = vunpack.c.l.bf16 %v3067_v2  ;;  %v3068_v7 = vld [vmem:[%s4611_s0 + $0xe0] sm:$0xff]   ;;  %v3069_v8 = vld [vmem:[%s4611_s0 + $0x78] sm:$0xff]   ;;  %v3070_v13 = vld [vmem:[%s4611_s0 + $0xb0] sm:$0xff]  }
   0x3   :  { %3186 = vmatpush3.bf16.msra.mxu0 %v501_v3  ;;  %v2877_v9 = vunpack.c.h.bf16 %v3067_v2  ;;  %v2880_v10 = vunpack.c.l.bf16 %v3068_v7  ;;  %v2881_v11 = vunpack.c.h.bf16 %v3068_v7  ;;  %v2884_v12 = vunpack.c.l.bf16 %v3069_v8  ;;  %v3071_v18 = vld [vmem:[%s4611_s0 + $0xe8] sm:$0xff]   ;;  %v3072_v19 = vld [vmem:[%s4611_s0 + $0x80] sm:$0xff]   ;;  %v3073_v32 = vld [vmem:[%s4611_s0 + $0xb8] sm:$0xff]  }
   0x4   :  { %v29_v14 = vmax.f32 %v2872_v4, 0.0  ;;  %v30_v15 = vmax.f32 %v2873_v5, 0.0  ;;  %v36_v16 = vmax.f32 %v2876_v6, 0.0  ;;  %v2885_v17 = vunpack.c.h.bf16 %v3069_v8  ;;  %v3074_v37 = vld [vmem:[%s4611_s0 + $0xf0] sm:$0xff]   ;;  %v3075_v38 = vld [vmem:[%s4611_s0 + $0x88] sm:$0xff]   ;;  %v3076_v51 = vld [vmem:[%s4611_s0 + $0xc0] sm:$0xff]  }
   0x5   :  { %v37_v20 = vmax.f32 %v2877_v9, 0.0  ;;  %v45_v21 = vmax.f32 %v2880_v10, 0.0  ;;  %v46_v22 = vmax.f32 %v2881_v11, 0.0  ;;  %v54_v23 = vmax.f32 %v2884_v12, 0.0  ;;  %v3077_v56 = vld [vmem:[%s4611_s0 + $0xf8] sm:$0xff]   ;;  %v3078_v57 = vld [vmem:[%s4611_s0 + $0x90] sm:$0xff]  }
   0x6   :  { %v38_v24 = vadd.f32 %v36_v16, %v29_v14  ;;  %v55_v25 = vmax.f32 %v2885_v17, 0.0  ;;  %v2888_v26 = vunpack.c.l.bf16 %v3070_v13  ;;  %v2889_v27 = vunpack.c.h.bf16 %v3070_v13  ;;  %v3079_v6 = vld [vmem:[%s4611_s0 + $0xc8] sm:$0xff]   ;;  %v3080_v11 = vld [vmem:[%s4611_s0 + $0x100] sm:$0xff]   ;;  %v3081_v12 = vld [vmem:[%s4611_s0 + $0x98] sm:$0xff]  }
   0x7   :  { %v39_v28 = vadd.f32 %v37_v20, %v30_v15  ;;  %v2892_v29 = vunpack.c.l.bf16 %v3071_v18  ;;  %v2893_v30 = vunpack.c.h.bf16 %v3071_v18  ;;  %v2896_v31 = vunpack.c.l.bf16 %v3072_v19  ;;  %v3082_v17 = vld [vmem:[%s4611_s0 + $0xd0] sm:$0xff]  }
   0x8   :  { %v3606_v33 = vadd.f32 %v45_v21, %v38_v24  ;;  %v61_v34 = vmax.f32 %v2888_v26, 0.0  ;;  %v62_v35 = vmax.f32 %v2889_v27, 0.0  ;;  %v2897_v36 = vunpack.c.h.bf16 %v3072_v19  ;;  %v3208_v27 = vld [vmem:[%s4612_s3 + $0x4] ss:$24 sps:$4 sm:$0xff]  }
   0x9   :  { %v3614_v39 = vadd.f32 %v46_v22, %v39_v28  ;;  %v70_v40 = vmax.f32 %v2892_v29, 0.0  ;;  %v71_v41 = vmax.f32 %v2893_v30, 0.0  ;;  %v79_v42 = vmax.f32 %v2896_v31, 0.0  ;;  %v3083_v22 = vld [vmem:[%s4611_s0 + $0x108] sm:$0xff]   ;;  %1732 = vmatprep.subr.bf16.mxu1 %v3208_v27  ;;  %v3092_v27 = vld [vmem:[%s4611_s0 + $0x18] sm:$0xff]  }
   0xa   :  { %v63_v43 = vadd.f32 %v61_v34, %v54_v23  ;;  %v64_v44 = vadd.f32 %v62_v35, %v55_v25  ;;  %v80_v45 = vmax.f32 %v2897_v36, 0.0  ;;  %v2900_v46 = vunpack.c.l.bf16 %v3073_v32  ;;  %v3212_v34 = vld [vmem:[%s4612_s3 + $0xc] ss:$24 sps:$4 sm:$0xff]  }
   0xb   :  { %v2901_v47 = vunpack.c.h.bf16 %v3073_v32  ;;  %v2904_v48 = vunpack.c.l.bf16 %v3074_v37  ;;  %v2905_v49 = vunpack.c.h.bf16 %v3074_v37  ;;  %v2908_v50 = vunpack.c.l.bf16 %v3075_v38  ;;  %v2955_v32 = vld [vmem:[%s4611_s0] sm:$0xff]   ;;  %1818 = vmatprep.subr.bf16.mxu0 %v3212_v34 }
   0xc   :  { %v3619_v52 = vadd.f32 %v70_v40, %v63_v43  ;;  %v3621_v53 = vadd.f32 %v71_v41, %v64_v44  ;;  %v86_v54 = vmax.f32 %v2900_v46, 0.0  ;;  %v2909_v55 = vunpack.c.h.bf16 %v3075_v38  ;;  %v3213_v40 = vld [vmem:[%s4612_s3] ss:$24 sps:$4 sm:$0xff]  }
   0xd   :  { %v87_v58 = vmax.f32 %v2901_v47, 0.0  ;;  %v95_v59 = vmax.f32 %v2904_v48, 0.0  ;;  %v96_v60 = vmax.f32 %v2905_v49, 0.0  ;;  %v104_v61 = vmax.f32 %v2908_v50, 0.0  ;;  %v3087_v50 = vld [vmem:[%s4611_s0 + $0x38] sm:$0xff]   ;;  %1733 = vmatpush1.bf16.msra.mxu1 %v3213_v40 }
   0xe   :  { %v88_v62 = vadd.f32 %v86_v54, %v79_v42  ;;  %v105_v63 = vmax.f32 %v2909_v55, 0.0  ;;  %v2912_v0 = vunpack.c.l.bf16 %v3076_v51  ;;  %v2913_v1 = vunpack.c.h.bf16 %v3076_v51  ;;  %v3088_v51 = vld [vmem:[%s4611_s0 + $0x8] sm:$0xff]  }
   0xf   :  { %v89_v2 = vadd.f32 %v87_v58, %v80_v45  ;;  %v2916_v3 = vunpack.c.l.bf16 %v3077_v56  ;;  %v2917_v4 = vunpack.c.h.bf16 %v3077_v56  ;;  %v2920_v5 = vunpack.c.l.bf16 %v3078_v57  ;;  %v3214_v45 = vld [vmem:[%s4612_s3 + $0x34] ss:$24 sps:$4 sm:$0xff]   ;;  %v3219_v58 = vld [vmem:[%s4612_s3 + $0x30] ss:$24 sps:$4 sm:$0xff]  }
  0x10   :  { %v3632_v7 = vadd.f32 %v95_v59, %v88_v62  ;;  %v111_v8 = vmax.f32 %v2912_v0, 0.0  ;;  %v112_v9 = vmax.f32 %v2913_v1, 0.0  ;;  %v2921_v10 = vunpack.c.h.bf16 %v3078_v57  ;;  %1734 = vmatprep.subr.bf16.mxu1 %v3214_v45 }
  0x11   :  { %v3640_v13 = vadd.f32 %v96_v60, %v89_v2  ;;  %v120_v14 = vmax.f32 %v2916_v3, 0.0  ;;  %v121_v15 = vmax.f32 %v2917_v4, 0.0  ;;  %v129_v16 = vmax.f32 %v2920_v5, 0.0  ;;  %v3089_v4 = vld [vmem:[%s4611_s0 + $0x40] sm:$0xff]   ;;  %v3090_v5 = vld [vmem:[%s4611_s0 + $0x10] sm:$0xff]   ;;  %1735 = vmatpush1.bf16.msra.mxu1 %v3219_v58 }
  0x12   :  { %v113_v18 = vadd.f32 %v111_v8, %v104_v61  ;;  %v114_v19 = vadd.f32 %v112_v9, %v105_v63  ;;  %v130_v20 = vmax.f32 %v2921_v10, 0.0  ;;  %v2924_v21 = vunpack.c.l.bf16 %v3079_v6  ;;  %v3220_v63 = vld [vmem:[%s4612_s3 + $0x64] ss:$24 sps:$4 sm:$0xff]  }
  0x13   :  { %v2925_v23 = vunpack.c.h.bf16 %v3079_v6  ;;  %v2928_v24 = vunpack.c.l.bf16 %v3080_v11  ;;  %v2929_v25 = vunpack.c.h.bf16 %v3080_v11  ;;  %v2932_v26 = vunpack.c.l.bf16 %v3081_v12  ;;  %v3225_v11 = vld [vmem:[%s4612_s3 + $0x60] ss:$24 sps:$4 sm:$0xff]   ;;  %1736 = vmatprep.subr.bf16.mxu1 %v3220_v63 }
  0x14   :  { %v3651_v28 = vadd.f32 %v120_v14, %v113_v18  ;;  %v3653_v29 = vadd.f32 %v121_v15, %v114_v19  ;;  %v136_v30 = vmax.f32 %v2924_v21, 0.0  ;;  %v2933_v31 = vunpack.c.h.bf16 %v3081_v12 }
  0x15   :  { %v137_v35 = vmax.f32 %v2925_v23, 0.0  ;;  %v145_v36 = vmax.f32 %v2928_v24, 0.0  ;;  %v146_v37 = vmax.f32 %v2929_v25, 0.0  ;;  %v154_v38 = vmax.f32 %v2932_v26, 0.0  ;;  %1737 = vmatpush1.bf16.msra.mxu1 %v3225_v11 }
  0x16   :  { %v138_v41 = vadd.f32 %v136_v30, %v129_v16  ;;  %v155_v42 = vmax.f32 %v2933_v31, 0.0  ;;  %v2936_v43 = vunpack.c.l.bf16 %v3082_v17  ;;  %v2937_v44 = vunpack.c.h.bf16 %v3082_v17  ;;  %v3226_v17 = vld [vmem:[%s4612_s3 + $0x94] ss:$24 sps:$4 sm:$0xff]  }
  0x17   :  { %v139_v46 = vadd.f32 %v137_v35, %v130_v20  ;;  %v2940_v47 = vunpack.c.l.bf16 %v3083_v22  ;;  %v2941_v48 = vunpack.c.h.bf16 %v3083_v22  ;;  %v2956_v49 = vunpack.c.l.bf16 %v2955_v32  ;;  %v3091_v22 = vld [vmem:[%s4611_s0 + $0x48] sm:$0xff]   ;;  %v3093_v30 = vld [vmem:[%s4611_s0 + $0x50] sm:$0xff]   ;;  %1738 = vmatprep.subr.bf16.mxu1 %v3226_v17 }
  0x18   :  { %v3673_v54 = vadd.f32 %v145_v36, %v138_v41  ;;  %v161_v55 = vmax.f32 %v2936_v43, 0.0  ;;  %v162_v56 = vmax.f32 %v2937_v44, 0.0  ;;  %v2957_v57 = vunpack.c.h.bf16 %v2955_v32  ;;  %v3231_v36 = vld [vmem:[%s4612_s3 + $0x90] ss:$24 sps:$4 sm:$0xff]  }
  0x19   :  { %v3678_v59 = vadd.f32 %v146_v37, %v139_v46  ;;  %v170_v60 = vmax.f32 %v2940_v47, 0.0  ;;  %v171_v61 = vmax.f32 %v2941_v48, 0.0  ;;  %v203_v62 = vmax.f32 %v2956_v49, 0.0  ;;  %v3094_v47 = vld [vmem:[%s4611_s0 + $0x20] sm:$0xff]   ;;  %1739 = vmatpush1.bf16.msra.mxu1 %v3231_v36 }
  0x1a   :  { %v163_v0 = vadd.f32 %v161_v55, %v154_v38  ;;  %v164_v1 = vadd.f32 %v162_v56, %v155_v42  ;;  %v204_v2 = vmax.f32 %v2957_v57, 0.0  ;;  %v2960_v3 = vunpack.c.l.bf16 %v3087_v50  ;;  %v3232_v42 = vld [vmem:[%s4612_s3 + $0xc4] ss:$24 sps:$4 sm:$0xff]  }
  0x1b   :  { %v205_v6 = vadd.f32 %v203_v62, %v3606_v33  ;;  %v2961_v8 = vunpack.c.h.bf16 %v3087_v50  ;;  %v2964_v9 = vunpack.c.l.bf16 %v3088_v51  ;;  %v2965_v10 = vunpack.c.h.bf16 %v3088_v51  ;;  %v3095_v55 = vld [vmem:[%s4611_s0 + $0x58] sm:$0xff]   ;;  %1740 = vmatprep.subr.bf16.mxu1 %v3232_v42 }
  0x1c   :  { %v3693_v12 = vadd.f32 %v170_v60, %v163_v0  ;;  %v3695_v14 = vadd.f32 %v171_v61, %v164_v1  ;;  %v206_v15 = vadd.f32 %v204_v2, %v3614_v39  ;;  %v212_v16 = vmax.f32 %v2960_v3, 0.0  ;;  %v3237_v61 = vld [vmem:[%s4612_s3 + $0xc0] ss:$24 sps:$4 sm:$0xff]   ;;  %v3096_v2 = vld [vmem:[%s4611_s0 + $0x28] sm:$0xff]  }
  0x1d   :  { %v213_v18 = vmax.f32 %v2961_v8, 0.0  ;;  %v221_v19 = vmax.f32 %v2964_v9, 0.0  ;;  %v222_v20 = vmax.f32 %v2965_v10, 0.0  ;;  %v2968_v21 = vunpack.c.l.bf16 %v3089_v4  ;;  %v3238_v3 = vld [vmem:[%s4612_s3 + $0xf4] ss:$24 sps:$4 sm:$0xff]   ;;  %1741 = vmatpush1.bf16.msra.mxu1 %v3237_v61 }
  0x1e   :  { %v3704_v23 = vadd.f32 %v212_v16, %v205_v6  ;;  %v2969_v24 = vunpack.c.h.bf16 %v3089_v4  ;;  %v2972_v25 = vunpack.c.l.bf16 %v3090_v5  ;;  %v2973_v26 = vunpack.c.h.bf16 %v3090_v5  ;;  %v3097_v16 = vld [vmem:[%s4611_s0 + $0x60] sm:$0xff]   ;;  %1742 = vmatprep.subr.bf16.mxu1 %v3238_v3 }
  0x1f   :  { %v3712_v31 = vadd.f32 %v213_v18, %v206_v15  ;;  %v223_v32 = vadd.f32 %v221_v19, %v3619_v52  ;;  %v224_v34 = vadd.f32 %v222_v20, %v3621_v53  ;;  %v230_v35 = vmax.f32 %v2968_v21, 0.0  ;;  %v3100_v21 = vld [vmem:[%s4611_s0 + $0x118] sm:$0xff]  }
  0x20   :  { %v231_v37 = vmax.f32 %v2969_v24, 0.0  ;;  %v239_v38 = vmax.f32 %v2972_v25, 0.0  ;;  %v240_v40 = vmax.f32 %v2973_v26, 0.0  ;;  %v2976_v41 = vunpack.c.l.bf16 %v3091_v22 }
  0x21   :  { %v3722_v43 = vadd.f32 %v230_v35, %v223_v32  ;;  %v2977_v44 = vunpack.c.h.bf16 %v3091_v22  ;;  %v2980_v45 = vunpack.c.l.bf16 %v3092_v27  ;;  %v2981_v46 = vunpack.c.h.bf16 %v3092_v27  ;;  %v3243_v22 = vld [vmem:[%s4612_s3 + $0xf0] ss:$24 sps:$4 sm:$0xff]  }
  0x22   :  { %v3727_v48 = vadd.f32 %v231_v37, %v224_v34  ;;  %v241_v49 = vadd.f32 %v239_v38, %v3632_v7  ;;  %v242_v50 = vadd.f32 %v240_v40, %v3640_v13  ;;  %v248_v51 = vmax.f32 %v2976_v41, 0.0  ;;  %v3102_v37 = vld [vmem:[%s4611_s0 + $0x120] sm:$0xff]   ;;  %1743 = vmatpush1.bf16.msra.mxu1 %v3243_v22 }
  0x23   :  { %v249_v56 = vmax.f32 %v2977_v44, 0.0  ;;  %v257_v57 = vmax.f32 %v2980_v45, 0.0  ;;  %v258_v58 = vmax.f32 %v2981_v46, 0.0  ;;  %v2984_v60 = vunpack.c.l.bf16 %v3093_v30  ;;  %v3104_v44 = vld [vmem:[%s4611_s0 + $0x128] sm:$0xff]   ;;  %v3106_v45 = vld [vmem:[%s4611_s0 + $0x130] sm:$0xff]  }
  0x24   :  { %v3737_v62 = vadd.f32 %v248_v51, %v241_v49  ;;  %v2985_v63 = vunpack.c.h.bf16 %v3093_v30  ;;  %v2988_v0 = vunpack.c.l.bf16 %v3094_v47  ;;  %v2989_v1 = vunpack.c.h.bf16 %v3094_v47  ;;  %v3244_v30 = vld [vmem:[%s4612_s3 + $0x124] ss:$24 sps:$4 sm:$0xff]   ;;  %v3249_v51 = vld [vmem:[%s4612_s3 + $0x120] ss:$24 sps:$4 sm:$0xff]  }
  0x25   :  { %v3745_v4 = vadd.f32 %v249_v56, %v242_v50  ;;  %v259_v5 = vadd.f32 %v257_v57, %v3651_v28  ;;  %v260_v6 = vadd.f32 %v258_v58, %v3653_v29  ;;  %v266_v8 = vmax.f32 %v2984_v60, 0.0  ;;  %1744 = vmatprep.subr.bf16.mxu1 %v3244_v30  ;;  %v3250_v60 = vld [vmem:[%s4612_s3 + $0x154] ss:$24 sps:$4 sm:$0xff]  }
  0x26   :  { %v267_v9 = vmax.f32 %v2985_v63, 0.0  ;;  %v275_v10 = vmax.f32 %v2988_v0, 0.0  ;;  %v276_v11 = vmax.f32 %v2989_v1, 0.0  ;;  %v2992_v15 = vunpack.c.l.bf16 %v3095_v55  ;;  %1745 = vmatpush1.bf16.msra.mxu1 %v3249_v51 }
  0x27   :  { %v3752_v17 = vadd.f32 %v266_v8, %v259_v5  ;;  %v2993_v18 = vunpack.c.h.bf16 %v3095_v55  ;;  %v2996_v19 = vunpack.c.l.bf16 %v3096_v2  ;;  %v2997_v20 = vunpack.c.h.bf16 %v3096_v2  ;;  %v3108_v2 = vld [vmem:[%s4611_s0 + $0x138] sm:$0xff]   ;;  %1746 = vmatprep.subr.bf16.mxu1 %v3250_v60 }
  0x28   :  { %v269_v24 = vadd.f32 %v267_v9, %v260_v6  ;;  %v277_v25 = vadd.f32 %v275_v10, %v3673_v54  ;;  %v278_v26 = vadd.f32 %v276_v11, %v3678_v59  ;;  %v284_v27 = vmax.f32 %v2992_v15, 0.0 }
  0x29   :  { %v285_v32 = vmax.f32 %v2993_v18, 0.0  ;;  %v293_v34 = vmax.f32 %v2996_v19, 0.0  ;;  %v294_v35 = vmax.f32 %v2997_v20, 0.0  ;;  %v3000_v36 = vunpack.c.l.bf16 %v3097_v16 }
  0x2a   :  { %v286_v38 = vadd.f32 %v284_v27, %v277_v25  ;;  %v3001_v40 = vunpack.c.h.bf16 %v3097_v16  ;;  %v3012_v41 = vunpack.c.l.bf16 %v3100_v21  ;;  %v3013_v42 = vunpack.c.h.bf16 %v3100_v21  ;;  %v3255_v16 = vld [vmem:[%s4612_s3 + $0x150] ss:$24 sps:$4 sm:$0xff]   ;;  %v3256_v21 = vld [vmem:[%s4612_s3 + $0x184] ss:$24 sps:$4 sm:$0xff]  }
  0x2b   :  { %v287_v46 = vadd.f32 %v285_v32, %v278_v26  ;;  %v295_v47 = vadd.f32 %v293_v34, %v3693_v12  ;;  %v296_v49 = vadd.f32 %v294_v35, %v3695_v14  ;;  %v302_v50 = vmax.f32 %v3000_v36, 0.0  ;;  %v3085_v35 = vld [vmem:[%s4611_s0 + $0xd8] sm:$0xff]   ;;  %1747 = vmatpush1.bf16.msra.mxu1 %v3255_v16 }
  0x2c   :  { %v303_v55 = vmax.f32 %v3001_v40, 0.0  ;;  %v329_v56 = vmax.f32 %v3012_v41, 0.0  ;;  %v330_v57 = vmax.f32 %v3013_v42, 0.0  ;;  %v3020_v58 = vunpack.c.l.bf16 %v3102_v37  ;;  %1748 = vmatprep.subr.bf16.mxu1 %v3256_v21 }
  0x2d   :  { %v304_v61 = vadd.f32 %v302_v50, %v295_v47  ;;  %v3021_v63 = vunpack.c.h.bf16 %v3102_v37  ;;  %v3028_v0 = vunpack.c.l.bf16 %v3104_v44  ;;  %v3029_v1 = vunpack.c.h.bf16 %v3104_v44  ;;  %v3086_v37 = vld [vmem:[%s4611_s0 + $0x110] sm:$0xff]  }
  0x2e   :  { %v305_v3 = vadd.f32 %v303_v55, %v296_v49  ;;  %v3786_v5 = vadd.f32 %v329_v56, %v3606_v33  ;;  %v3789_v6 = vadd.f32 %v330_v57, %v3614_v39  ;;  %v347_v8 = vmax.f32 %v3020_v58, 0.0  ;;  %v3084_v39 = vld [vmem:[%s4611_s0 + $0xa0] sm:$0xff]   ;;  %v3267_v56 = vld [vmem:[%s4612_s3 + $0x1b0] ss:$24 sps:$4 sm:$0xff]  }
  0x2f   :  { %v348_v9 = vmax.f32 %v3021_v63, 0.0  ;;  %v365_v10 = vmax.f32 %v3028_v0, 0.0  ;;  %v366_v11 = vmax.f32 %v3029_v1, 0.0  ;;  %v3036_v15 = vunpack.c.l.bf16 %v3106_v45 }
  0x30   :  { %v3795_v18 = vadd.f32 %v347_v8, %v3619_v52  ;;  %v3037_v19 = vunpack.c.h.bf16 %v3106_v45  ;;  %v3044_v20 = vunpack.c.l.bf16 %v3108_v2  ;;  %v3045_v33 = vunpack.c.h.bf16 %v3108_v2 }
  0x31   :  { %v3804_v22 = vadd.f32 %v348_v9, %v3621_v53  ;;  %v3807_v25 = vadd.f32 %v365_v10, %v3632_v7  ;;  %v3810_v52 = vadd.f32 %v366_v11, %v3640_v13  ;;  %v383_v26 = vmax.f32 %v3036_v15, 0.0  ;;  %v3103_v10 = vld [vmem:[%s4611_s0 + $0x158] sm:$0xff]  }
  0x32   :  { %v384_v27 = vmax.f32 %v3037_v19, 0.0  ;;  %v401_v30 = vmax.f32 %v3044_v20, 0.0  ;;  %v402_v32 = vmax.f32 %v3045_v33, 0.0  ;;  %v450_v34 = vadd.f32 %v3752_v17, %v3737_v62  ;;  %v3261_v62 = vld [vmem:[%s4612_s3 + $0x180] ss:$24 sps:$4 sm:$0xff]  }
  0x33   :  { %v3818_v53 = vadd.f32 %v383_v26, %v3651_v28  ;;  %v451_v7 = vadd.f32 %v269_v24, %v3745_v4  ;;  %v2944_v36 = vunpack.c.l.bf16 %v3084_v39  ;;  %v2945_v13 = vunpack.c.h.bf16 %v3084_v39  ;;  %v3262_v24 = vld [vmem:[%s4612_s3 + $0x1b4] ss:$24 sps:$4 sm:$0xff]   ;;  %1749 = vmatpush1.bf16.msra.mxu1 %v3261_v62  ;;  %v3273_v20 = vld [vmem:[%s4612_s3 + $0x1e0] ss:$24 sps:$4 sm:$0xff]  }
  0x34   :  { %v3828_v17 = vadd.f32 %v384_v27, %v3653_v29  ;;  %v3831_v40 = vadd.f32 %v401_v30, %v3673_v54  ;;  %v3834_v28 = vadd.f32 %v402_v32, %v3678_v59  ;;  %v452_v4 = vadd.f32 %v450_v34, %v286_v38  ;;  %v3098_v29 = vld [vmem:[%s4611_s0 + $0x30] sm:$0xff]   ;;  %v3099_v38 = vld [vmem:[%s4611_s0 + $0x68] sm:$0xff]   ;;  %1750 = vmatprep.subr.bf16.mxu1 %v3262_v24 }
  0x35   :  { %v453_v41 = vadd.f32 %v451_v7, %v287_v46  ;;  %v179_v42 = vmax.f32 %v2944_v36, 0.0  ;;  %v180_v44 = vmax.f32 %v2945_v13, 0.0  ;;  %v2948_v45 = vunpack.c.l.bf16 %v3085_v35  ;;  %v3107_v27 = vld [vmem:[%s4611_s0 + $0x168] sm:$0xff]   ;;  %v3109_v24 = vld [vmem:[%s4611_s0 + $0x170] sm:$0xff]  }
  0x36   :  { %v454_v54 = vadd.f32 %v452_v4, %v3704_v23  ;;  %v3843_v47 = vadd.f32 %v452_v4, %v304_v61  ;;  %v2949_v59 = vunpack.c.h.bf16 %v3085_v35  ;;  %v2952_v49 = vunpack.c.l.bf16 %v3086_v37  ;;  %v3101_v61 = vld [vmem:[%s4611_s0 + $0x150] sm:$0xff]  }
  0x37   :  { %v455_v50 = vadd.f32 %v453_v41, %v3712_v31  ;;  %v3849_v46 = vadd.f32 %v453_v41, %v305_v3  ;;  %v186_v51 = vmax.f32 %v2948_v45, 0.0  ;;  %v2953_v55 = vunpack.c.h.bf16 %v3086_v37  ;;  %v3268_v31 = vld [vmem:[%s4612_s3 + $0x1e4] ss:$24 sps:$4 sm:$0xff]   ;;  %1751 = vmatpush1.bf16.msra.mxu1 %v3267_v56  ;;  %v3274_v30 = vld [vmem:[%s4612_s3 + $0x214] ss:$24 sps:$4 sm:$0xff]  }
  0x38   :  { %v456_v23 = vadd.f32 %v454_v54, %v3722_v43  ;;  %v187_v57 = vmax.f32 %v2949_v59, 0.0  ;;  %v195_v58 = vmax.f32 %v2952_v49, 0.0  ;;  %v3004_v60 = vunpack.c.l.bf16 %v3098_v29  ;;  %1752 = vmatprep.subr.bf16.mxu1 %v3268_v31  ;;  %v3279_v36 = vld [vmem:[%s4612_s3 + $0x210] ss:$24 sps:$4 sm:$0xff]   ;;  %v3110_v41 = vld [vmem:[%s4611_s0 + $0x140] sm:$0xff]   ;;  %v3111_v59 = vld [vmem:[%s4611_s0 + $0x178] sm:$0xff]  }
  0x39   :  { %v457_v63 = vadd.f32 %v455_v50, %v3727_v48  ;;  %v188_v0 = vadd.f32 %v186_v51, %v179_v42  ;;  %v196_v1 = vmax.f32 %v2953_v55, 0.0  ;;  %v3005_v2 = vunpack.c.h.bf16 %v3098_v29  ;;  %v3105_v48 = vld [vmem:[%s4611_s0 + $0x160] sm:$0xff]  }
  0x3a   :  { %v189_v3 = vadd.f32 %v187_v57, %v180_v44  ;;  %v311_v8 = vmax.f32 %v3004_v60, 0.0  ;;  %v3008_v43 = vunpack.c.l.bf16 %v3099_v38  ;;  %v3009_v9 = vunpack.c.h.bf16 %v3099_v38  ;;  %v3280_v42 = vld [vmem:[%s4612_s3 + $0x244] ss:$24 sps:$4 sm:$0xff]   ;;  %v3210_v57 = vld [vmem:[%s4612_s3 + $0x8] ss:$24 sps:$4 sm:$0xff]  }
  0x3b   :  { %v474_v11 = vpack.c.bf16 %v457_v63, %v456_v23  ;;  %v3865_v15 = vadd.f32 %v195_v58, %v188_v0  ;;  %v312_v16 = vmax.f32 %v3005_v2, 0.0  ;;  %v3016_v19 = vunpack.c.l.bf16 %v3101_v61  ;;  %1753 = vmatpush1.bf16.msra.mxu1 %v3273_v20 }
  0x3c   :  { %v3873_v33 = vadd.f32 %v196_v1, %v189_v3  ;;  %v320_v39 = vmax.f32 %v3008_v43, 0.0  ;;  %v321_v21 = vmax.f32 %v3009_v9, 0.0  ;;  %v3017_v26 = vunpack.c.h.bf16 %v3101_v61  ;;  %1754 = vmatprep.subr.bf16.mxu1 %v3274_v30 }
  0x3d   :  { %3187 = vmatprep.mubr.msk.bf16.mxu0 %vm486_vm1, %v474_v11  ;;  %v313_v32 = vadd.f32 %v311_v8, %v3865_v15  ;;  %v338_v34 = vmax.f32 %v3016_v19, 0.0  ;;  %v3024_v35 = vunpack.c.l.bf16 %v3103_v10  ;;  %v3025_v7 = vunpack.c.h.bf16 %v3103_v10  ;;  %v3113_v8 = vld [vmem:[%s4611_s0 + $0x180] sm:$0xff]  }
  0x3e   :  { %v314_v13 = vadd.f32 %v312_v16, %v3873_v33  ;;  %v339_v37 = vmax.f32 %v3017_v26, 0.0  ;;  %v3032_v62 = vunpack.c.l.bf16 %v3105_v48  ;;  %v3033_v4 = vunpack.c.h.bf16 %v3105_v48  ;;  %v3216_v16 = vld [vmem:[%s4612_s3 + $0x38] ss:$24 sps:$4 sm:$0xff]  }
  0x3f   :  { %v322_v44 = vadd.f32 %v320_v39, %v313_v32  ;;  %v3897_v45 = vadd.f32 %v338_v34, %v3786_v5  ;;  %v356_v29 = vmax.f32 %v3024_v35, 0.0  ;;  %v357_v54 = vmax.f32 %v3025_v7, 0.0  ;;  %1755 = vmatpush1.bf16.msra.mxu1 %v3279_v36 }
  0x40   :  { %v323_v49 = vadd.f32 %v321_v21, %v314_v13  ;;  %v3903_v38 = vadd.f32 %v339_v37, %v3789_v6  ;;  %v374_v50 = vmax.f32 %v3032_v62, 0.0  ;;  %v375_v51 = vmax.f32 %v3033_v4, 0.0  ;;  %1756 = vmatprep.subr.bf16.mxu1 %v3280_v42  ;;  %v3224_v21 = vld [vmem:[%s4612_s3 + $0x6c] ss:$24 sps:$4 sm:$0xff]  }
  0x41   :  { %v460_v55 = vadd.f32 %v3843_v47, %v322_v44  ;;  %v3907_v56 = vadd.f32 %v356_v29, %v3795_v18  ;;  %v3910_v5 = vadd.f32 %v357_v54, %v3804_v22  ;;  %v3040_v23 = vunpack.c.l.bf16 %v3107_v27  ;;  %v3218_v18 = vld [vmem:[%s4612_s3 + $0x3c] ss:$24 sps:$4 sm:$0xff]   ;;  %v3285_v22 = vld [vmem:[%s4612_s3 + $0x240] ss:$24 sps:$4 sm:$0xff]  }
  0x42   :  { %v461_v58 = vadd.f32 %v3849_v46, %v323_v49  ;;  %v376_v6 = vadd.f32 %v374_v50, %v3807_v25  ;;  %v377_v60 = vadd.f32 %v375_v51, %v3810_v52  ;;  %v3041_v61 = vunpack.c.h.bf16 %v3107_v27  ;;  %v3112_v46 = vld [vmem:[%s4611_s0 + $0x148] sm:$0xff]  }
  0x43   :  { %v392_v47 = vmax.f32 %v3040_v23, 0.0  ;;  %v3048_v31 = vunpack.c.l.bf16 %v3109_v24  ;;  %v3049_v63 = vunpack.c.h.bf16 %v3109_v24  ;;  %v3052_v0 = vunpack.c.l.bf16 %v3110_v41  ;;  %v3286_v25 = vld [vmem:[%s4612_s3 + $0x274] ss:$24 sps:$4 sm:$0xff]   ;;  %1757 = vmatpush1.bf16.msra.mxu1 %v3285_v22  ;;  %v3246_v22 = vld [vmem:[%s4612_s3 + $0x128] ss:$24 sps:$4 sm:$0xff]  }
  0x44   :  { %v475_v52 = vpack.c.bf16 %v461_v58, %v460_v55  ;;  %v393_v1 = vmax.f32 %v3041_v61, 0.0  ;;  %v3053_v2 = vunpack.c.h.bf16 %v3110_v41  ;;  %v3056_v3 = vunpack.c.l.bf16 %v3111_v59  ;;  %1758 = vmatprep.subr.bf16.mxu1 %v3286_v25  ;;  %v3240_v61 = vld [vmem:[%s4612_s3 + $0xf8] ss:$24 sps:$4 sm:$0xff]  }
  0x45   :  { %v394_v43 = vadd.f32 %v392_v47, %v3818_v53  ;;  %v410_v9 = vmax.f32 %v3048_v31, 0.0  ;;  %v411_v10 = vmax.f32 %v3049_v63, 0.0  ;;  %v419_v11 = vmax.f32 %v3052_v0, 0.0  ;;  %v3291_v53 = vld [vmem:[%s4612_s3 + $0x270] ss:$24 sps:$4 sm:$0xff]  }
  0x46   :  { %3188 = vmatmul.mubr.msk.bf16.vlgmr.msra.gmra.mrb[0].mxu0 %vm486_vm1, %v475_v52  ;;  %v395_v19 = vadd.f32 %v393_v1, %v3828_v17  ;;  %v420_v48 = vmax.f32 %v3053_v2, 0.0  ;;  %v3057_v20 = vunpack.c.h.bf16 %v3111_v59  ;;  %v428_v39 = vmax.f32 %v3056_v3, 0.0  ;;  %v3254_v47 = vld [vmem:[%s4612_s3 + $0x15c] ss:$24 sps:$4 sm:$0xff]   ;;  %v3252_v31 = vld [vmem:[%s4612_s3 + $0x158] ss:$24 sps:$4 sm:$0xff]  }
  0x47   :  { %v412_v26 = vadd.f32 %v410_v9, %v3831_v40  ;;  %v413_v27 = vadd.f32 %v411_v10, %v3834_v28  ;;  %v462_v30 = vadd.f32 %v394_v43, %v376_v6  ;;  %v421_v32 = vadd.f32 %v419_v11, %v3693_v12  ;;  %1819 = vmatpush1.bf16.msra.mxu0 %v3210_v57  ;;  %v3222_v40 = vld [vmem:[%s4612_s3 + $0x68] ss:$24 sps:$4 sm:$0xff]   ;;  %v3260_v63 = vld [vmem:[%s4612_s3 + $0x18c] ss:$24 sps:$4 sm:$0xff]   ;;  %v3264_v25 = vld [vmem:[%s4612_s3 + $0x1b8] ss:$24 sps:$4 sm:$0xff]  }
  0x48   :  { %v463_v17 = vadd.f32 %v395_v19, %v377_v60  ;;  %v422_v34 = vadd.f32 %v420_v48, %v3695_v14  ;;  %v429_v35 = vmax.f32 %v3057_v20, 0.0  ;;  %v3060_v7 = vunpack.c.l.bf16 %v3112_v46  ;;  %1820 = vmatprep.subr.bf16.mxu0 %v3218_v18  ;;  %v3230_v14 = vld [vmem:[%s4612_s3 + $0x9c] ss:$24 sps:$4 sm:$0xff]   ;;  %1759 = vmatpush1.bf16.msra.mxu1 %v3291_v53  ;;  %v3248_v18 = vld [vmem:[%s4612_s3 + $0x12c] ss:$24 sps:$4 sm:$0xff]  }
  0x49   :  { %v464_v36 = vadd.f32 %v462_v30, %v412_v26  ;;  %v430_v13 = vadd.f32 %v428_v39, %v421_v32  ;;  %v3061_v37 = vunpack.c.h.bf16 %v3112_v46  ;;  %v3064_v62 = vunpack.c.l.bf16 %v3113_v8  ;;  %v3258_v0 = vld [vmem:[%s4612_s3 + $0x188] ss:$24 sps:$4 sm:$0xff]   ;;  %v3266_v46 = vld [vmem:[%s4612_s3 + $0x1bc] ss:$24 sps:$4 sm:$0xff]   ;;  %v3272_v52 = vld [vmem:[%s4612_s3 + $0x1ec] ss:$24 sps:$4 sm:$0xff]  }
  0x4a   :  { %v465_v28 = vadd.f32 %v463_v17, %v413_v27  ;;  %v431_v4 = vadd.f32 %v429_v35, %v422_v34  ;;  %v437_v12 = vmax.f32 %v3060_v7, 0.0  ;;  %v3065_v24 = vunpack.c.h.bf16 %v3113_v8  ;;  %v3270_v1 = vld [vmem:[%s4612_s3 + $0x1e8] ss:$24 sps:$4 sm:$0xff]   ;;  %v3278_v2 = vld [vmem:[%s4612_s3 + $0x21c] ss:$24 sps:$4 sm:$0xff]  }
  0x4b   :  { %v466_v41 = vadd.f32 %v464_v36, %v3897_v45  ;;  %v438_v42 = vmax.f32 %v3061_v37, 0.0  ;;  %v446_v44 = vmax.f32 %v3064_v62, 0.0  ;;  %1821 = vmatpush1.bf16.msra.mxu0 %v3216_v16  ;;  %v470_v49 = vadd.f32 %v464_v36, %v430_v13  ;;  %v3228_v45 = vld [vmem:[%s4612_s3 + $0x98] ss:$24 sps:$4 sm:$0xff]   ;;  %v3284_v8 = vld [vmem:[%s4612_s3 + $0x24c] ss:$24 sps:$4 sm:$0xff]  }
  0x4c   :  { %v467_v29 = vadd.f32 %v465_v28, %v3903_v38  ;;  %v439_v54 = vadd.f32 %v437_v12, %v3865_v15  ;;  %v447_v59 = vmax.f32 %v3065_v24, 0.0  ;;  %1822 = vmatprep.subr.bf16.mxu0 %v3224_v21  ;;  %v471_v55 = vadd.f32 %v465_v28, %v431_v4  ;;  %v3236_v15 = vld [vmem:[%s4612_s3 + $0xcc] ss:$24 sps:$4 sm:$0xff]   ;;  %v3276_v3 = vld [vmem:[%s4612_s3 + $0x218] ss:$24 sps:$4 sm:$0xff]  }
  0x4d   :  { %v468_v50 = vadd.f32 %v466_v41, %v3907_v56  ;;  %v440_v51 = vadd.f32 %v438_v42, %v3873_v33  ;;  %v3234_v33 = vld [vmem:[%s4612_s3 + $0xc8] ss:$24 sps:$4 sm:$0xff]   ;;  %v3290_v9 = vld [vmem:[%s4612_s3 + $0x27c] ss:$24 sps:$4 sm:$0xff]   ;;  %v3288_v10 = vld [vmem:[%s4612_s3 + $0x278] ss:$24 sps:$4 sm:$0xff]  }
  0x4e   :  { %v469_v23 = vadd.f32 %v467_v29, %v3910_v5  ;;  %v448_v57 = vadd.f32 %v446_v44, %v439_v54  ;;  %v3242_v5 = vld [vmem:[%s4612_s3 + $0xfc] ss:$24 sps:$4 sm:$0xff]   ;;  %v3282_v43 = vld [vmem:[%s4612_s3 + $0x248] ss:$24 sps:$4 sm:$0xff]   ;;  %v3296_v16 = vld [vmem:[%s4612_s3 + $0x2ac] ss:$24 sps:$4 sm:$0xff]  }
  0x4f   :  { %v449_v38 = vadd.f32 %v447_v59, %v440_v51  ;;  %1823 = vmatpush1.bf16.msra.mxu0 %v3222_v40  ;;  %v3292_v11 = vld [vmem:[%s4612_s3 + $0x2a4] ss:$24 sps:$4 sm:$0xff]   ;;  %v3294_v19 = vld [vmem:[%s4612_s3 + $0x2a8] ss:$24 sps:$4 sm:$0xff]   ;;  %v3298_v20 = vld [vmem:[%s4612_s3 + $0x2d4] ss:$24 sps:$4 sm:$0xff]  }
  0x50   :  { %v476_v58 = vpack.c.bf16 %v469_v23, %v468_v50  ;;  %v472_v6 = vadd.f32 %v470_v49, %v448_v57  ;;  %1824 = vmatprep.subr.bf16.mxu0 %v3230_v14  ;;  %v3297_v48 = vld [vmem:[%s4612_s3 + $0x2a0] ss:$24 sps:$4 sm:$0xff]   ;;  %1760 = vmatprep.subr.bf16.mxu1 %v3292_v11  ;;  %v3302_v39 = vld [vmem:[%s4612_s3 + $0x2dc] ss:$24 sps:$4 sm:$0xff]   ;;  %v3303_v53 = vld [vmem:[%s4612_s3 + $0x2d0] ss:$24 sps:$4 sm:$0xff]  }
  0x51   :  { %v473_v56 = vadd.f32 %v471_v55, %v449_v38  ;;  %1761 = vmatpush1.bf16.msra.mxu1 %v3297_v48  ;;  %v3300_v21 = vld [vmem:[%s4612_s3 + $0x2d8] ss:$24 sps:$4 sm:$0xff]   ;;  %v3306_v26 = vld [vmem:[%s4612_s3 + $0x304] ss:$24 sps:$4 sm:$0xff]   ;;  %v2624_v30 = vld [vmem:[%s4613_s2] ss:$0 sm:$0xff] }
  0x52   :  { %3191 = vmatprep.mubr.msk.bf16.mxu0 %vm486_vm1, %v476_v58  ;;  %1762 = vmatprep.subr.bf16.mxu1 %v3298_v20  ;;  %v3309_v27 = vld [vmem:[%s4612_s3 + $0x30c] ss:$24 sps:$4 sm:$0xff]   ;;  %v3304_v24 = vld [vmem:[%s4612_s3 + $0x300] ss:$24 sps:$4 sm:$0xff]   ;;  %v3315_v44 = vld [vmem:[%s4612_s3 + $0x33c] ss:$24 sps:$4 sm:$0xff]  }
  0x53   :  { %v477_v60 = vpack.c.bf16 %v473_v56, %v472_v6  ;;  %1825 = vmatpush1.bf16.msra.mxu0 %v3228_v45  ;;  %v3307_v14 = vld [vmem:[%s4612_s3 + $0x308] ss:$24 sps:$4 sm:$0xff]   ;;  %v3312_v42 = vld [vmem:[%s4612_s3 + $0x334] ss:$24 sps:$4 sm:$0xff]   ;;  %v3313_v54 = vld [vmem:[%s4612_s3 + $0x338] ss:$24 sps:$4 sm:$0xff]  }
  0x54   :  { %1826 = vmatprep.subr.bf16.mxu0 %v3236_v15  ;;  %v3310_v29 = vld [vmem:[%s4612_s3 + $0x330] ss:$24 sps:$4 sm:$0xff]   ;;  %v3318_v59 = vld [vmem:[%s4612_s3 + $0x364] ss:$24 sps:$4 sm:$0xff]   ;;  %v3316_v50 = vld [vmem:[%s4612_s3 + $0x360] ss:$24 sps:$4 sm:$0xff]  }
  0x55   :  { %3192 = vmatmul.mubr.msk.bf16.gmra.mrb[4].mxu0 %vm486_vm1, %v477_v60  ;;  %1763 = vmatpush1.bf16.msra.mxu1 %v3303_v53  ;;  %v3321_v49 = vld [vmem:[%s4612_s3 + $0x36c] ss:$24 sps:$4 sm:$0xff]   ;;  %v3319_v51 = vld [vmem:[%s4612_s3 + $0x368] ss:$24 sps:$4 sm:$0xff]   ;;  %v3327_v23 = vld [vmem:[%s4612_s3 + $0x39c] ss:$24 sps:$4 sm:$0xff]  }
  0x56   :  { %1775 = vmatprep.subr.bf16.mxu1 %v3306_v26  ;;  %v3324_v45 = vld [vmem:[%s4612_s3 + $0x394] ss:$24 sps:$4 sm:$0xff]   ;;  %v3325_v60 = vld [vmem:[%s4612_s3 + $0x398] ss:$24 sps:$4 sm:$0xff]   ;;  %v3343_v11 = vld [vmem:[%s4612_s3 + $0x428] ss:$24 sps:$4 sm:$0xff]  }
  0x57   :  { %1827 = vmatpush1.bf16.msra.mxu0 %v3234_v33  ;;  %v3346_v48 = vld [vmem:[%s4612_s3 + $0x450] ss:$24 sps:$4 sm:$0xff]   ;;  %v3352_v53 = vld [vmem:[%s4612_s3 + $0x480] ss:$24 sps:$4 sm:$0xff]  }
  0x58   :  { %1828 = vmatprep.subr.bf16.mxu0 %v3242_v5  ;;  %v3322_v5 = vld [vmem:[%s4612_s3 + $0x390] ss:$24 sps:$4 sm:$0xff]  }
  0x59   :  { %v3349_v20 = vld [vmem:[%s4612_s3 + $0x458] ss:$24 sps:$4 sm:$0xff]   ;;  %v3355_v26 = vld [vmem:[%s4612_s3 + $0x488] ss:$24 sps:$4 sm:$0xff]  }
  0x5b   :  { %1829 = vmatpush1.bf16.msra.mxu0 %v3240_v61 }
  0x5c   :  { %1830 = vmatprep.subr.bf16.mxu0 %v3248_v18 }
  0x5f   :  { %1831 = vmatpush1.bf16.msra.mxu0 %v3246_v22  ;;  %v3330_v22 = vld [vmem:[%s4612_s3 + $0x3c4] ss:$24 sps:$4 sm:$0xff]  }
  0x60   :  { %1832 = vmatprep.subr.bf16.mxu0 %v3254_v47  ;;  %v3333_v47 = vld [vmem:[%s4612_s3 + $0x3cc] ss:$24 sps:$4 sm:$0xff]  }
  0x63   :  { %1833 = vmatpush1.bf16.msra.mxu0 %v3252_v31 }
  0x64   :  { %1834 = vmatprep.subr.bf16.mxu0 %v3260_v63 }
  0x67   :  { %1835 = vmatpush1.bf16.msra.mxu0 %v3258_v0 }
  0x68   :  { %1836 = vmatprep.subr.bf16.mxu0 %v3266_v46  ;;  %v3328_v46 = vld [vmem:[%s4612_s3 + $0x3c0] ss:$24 sps:$4 sm:$0xff]  }
  0x6b   :  { %1837 = vmatpush1.bf16.msra.mxu0 %v3264_v25  ;;  %v3331_v25 = vld [vmem:[%s4612_s3 + $0x3c8] ss:$24 sps:$4 sm:$0xff]  }
  0x6c   :  { %1838 = vmatprep.subr.bf16.mxu0 %v3272_v52 }
  0x6f   :  { %1839 = vmatpush1.bf16.msra.mxu0 %v3270_v1  ;;  %v3336_v1 = vld [vmem:[%s4612_s3 + $0x3f4] ss:$24 sps:$4 sm:$0xff]  }
  0x70   :  { %1840 = vmatprep.subr.bf16.mxu0 %v3278_v2  ;;  %v3339_v2 = vld [vmem:[%s4612_s3 + $0x3fc] ss:$24 sps:$4 sm:$0xff]  }
  0x73   :  { %1841 = vmatpush1.bf16.msra.mxu0 %v3276_v3  ;;  %v3334_v3 = vld [vmem:[%s4612_s3 + $0x3f0] ss:$24 sps:$4 sm:$0xff]  }
  0x74   :  { %1842 = vmatprep.subr.bf16.mxu0 %v3284_v8  ;;  %v3337_v8 = vld [vmem:[%s4612_s3 + $0x3f8] ss:$24 sps:$4 sm:$0xff]  }
  0x77   :  { %1843 = vmatpush1.bf16.msra.mxu0 %v3282_v43  ;;  %v3342_v43 = vld [vmem:[%s4612_s3 + $0x424] ss:$24 sps:$4 sm:$0xff]  }
  0x78   :  { %1844 = vmatprep.subr.bf16.mxu0 %v3290_v9  ;;  %v3345_v9 = vld [vmem:[%s4612_s3 + $0x42c] ss:$24 sps:$4 sm:$0xff]  }
  0x7b   :  { %1845 = vmatpush1.bf16.msra.mxu0 %v3288_v10  ;;  %v3340_v10 = vld [vmem:[%s4612_s3 + $0x420] ss:$24 sps:$4 sm:$0xff]  }
  0x7c   :  { %1846 = vmatprep.subr.bf16.mxu0 %v3296_v16  ;;  %v3348_v16 = vld [vmem:[%s4612_s3 + $0x454] ss:$24 sps:$4 sm:$0xff]  }
  0x7f   :  { %1847 = vmatpush1.bf16.msra.mxu0 %v3294_v19  ;;  %v3351_v19 = vld [vmem:[%s4612_s3 + $0x45c] ss:$24 sps:$4 sm:$0xff]  }
  0x80   :  { %1848 = vmatprep.subr.bf16.mxu0 %v3302_v39  ;;  %v3354_v39 = vld [vmem:[%s4612_s3 + $0x484] ss:$24 sps:$4 sm:$0xff]  }
  0x83   :  { %1849 = vmatpush1.bf16.msra.mxu0 %v3300_v21  ;;  %v3357_v21 = vld [vmem:[%s4612_s3 + $0x48c] ss:$24 sps:$4 sm:$0xff]  }
  0x84   :  { %1861 = vmatprep.subr.bf16.mxu0 %v3309_v27  ;;  %v3360_v27 = vld [vmem:[%s4612_s3 + $0x4b4] ss:$24 sps:$4 sm:$0xff]  }
 0x119   :  { %v3189_v32 = vpop.f32.mrb[0].mxu0 }
 0x11a   :  { %v546_v17 = vadd.f32 %v3189_v32, %v2624_v30  ;;  %v537_v34 = vpop.f32.mrb[1].mxu0  ;;  %v3358_v32 = vld [vmem:[%s4612_s3 + $0x4b0] ss:$24 sps:$4 sm:$0xff]  }
 0x11b   :  { %v538_v35 = vadd.f32 %v2624_v30, %v537_v34  ;;  %v3190_v7 = vpop.f32.mrb[2].mxu0  ;;  %v3366_v34 = vld [vmem:[%s4612_s3 + $0x4e4] ss:$24 sps:$4 sm:$0xff]  }
 0x11c   :  { %v549_v36 = vadd.f32 %v3190_v7, %v2624_v30  ;;  %v540_v13 = vpop.f32.mrb[3].mxu0  ;;  %v570_v62 = vmax.f32 %v546_v17, 0.0  ;;  %v3361_v17 = vld [vmem:[%s4612_s3 + $0x4b8] ss:$24 sps:$4 sm:$0xff]  }
 0x11d   :  { %v541_v37 = vadd.f32 %v2624_v30, %v540_v13  ;;  %v568_v28 = vmax.f32 %v538_v35, 0.0  ;;  %v3369_v35 = vld [vmem:[%s4612_s3 + $0x4ec] ss:$24 sps:$4 sm:$0xff]   ;;  %v3364_v7 = vld [vmem:[%s4612_s3 + $0x4e0] ss:$24 sps:$4 sm:$0xff]  }
 0x11e   :  { %v571_v40 = vmax.f32 %v549_v36, 0.0  ;;  %v3367_v36 = vld [vmem:[%s4612_s3 + $0x4e8] ss:$24 sps:$4 sm:$0xff]   ;;  %v3372_v13 = vld [vmem:[%s4612_s3 + $0x514] ss:$24 sps:$4 sm:$0xff]  }
 0x11f   :  { %v569_v4 = vmax.f32 %v541_v37, 0.0  ;;  %v3375_v37 = vld [vmem:[%s4612_s3 + $0x51c] ss:$24 sps:$4 sm:$0xff]  }
 0x120   :  { %v4059_v12 = vpack.c.bf16 %v571_v40, %v570_v62  ;;  %v3370_v62 = vld [vmem:[%s4612_s3 + $0x510] ss:$24 sps:$4 sm:$0xff]  }
 0x121   :  { %v4067_v41 = vpack.c.bf16 %v569_v4, %v568_v28  ;;  %v3373_v40 = vld [vmem:[%s4612_s3 + $0x518] ss:$24 sps:$4 sm:$0xff]   ;;  %v3378_v28 = vld [vmem:[%s4612_s3 + $0x544] ss:$24 sps:$4 sm:$0xff]  }
 0x122   :  { %1764 = vmatprep.mubr.bf16.mxu1 %v4059_v12  ;;  %1850 = vmatprep.mubr.bf16.mxu0 %v4059_v12  ;;  %v3381_v4 = vld [vmem:[%s4612_s3 + $0x54c] ss:$24 sps:$4 sm:$0xff]  }
 0x123   :  { %1765 = vmatmul.mubr.bf16.vlgmr.msra.gmra.mrb[0].mxu1 %v4067_v41  ;;  %1851 = vmatmul.mubr.bf16.vlgmr.msra.gmra.mrb[8].mxu0 %v4067_v41 }
 0x124   :  { %1776 = vmatpush1.bf16.msra.mxu1 %v3304_v24  ;;  %1862 = vmatpush1.bf16.msra.mxu0 %v3307_v14  ;;  %v3376_v24 = vld [vmem:[%s4612_s3 + $0x540] ss:$24 sps:$4 sm:$0xff]  }
 0x125   :  { %1777 = vmatprep.subr.bf16.mxu1 %v3312_v42  ;;  %1863 = vmatprep.subr.bf16.mxu0 %v3315_v44  ;;  %v3379_v14 = vld [vmem:[%s4612_s3 + $0x548] ss:$24 sps:$4 sm:$0xff]   ;;  %v3384_v42 = vld [vmem:[%s4612_s3 + $0x574] ss:$24 sps:$4 sm:$0xff]  }
 0x126   :  { %v3387_v44 = vld [vmem:[%s4612_s3 + $0x57c] ss:$24 sps:$4 sm:$0xff]  }
 0x128   :  { %1778 = vmatpush1.bf16.msra.mxu1 %v3310_v29  ;;  %1864 = vmatpush1.bf16.msra.mxu0 %v3313_v54  ;;  %v3193_v55 = vpop.f32.mrb[4].mxu0  ;;  %v3382_v29 = vld [vmem:[%s4612_s3 + $0x570] ss:$24 sps:$4 sm:$0xff]  }
 0x129   :  { %1779 = vmatprep.subr.bf16.mxu1 %v3318_v59  ;;  %1865 = vmatprep.subr.bf16.mxu0 %v3321_v49  ;;  %v562_v57 = vadd.f32 %v3193_v55, %v2624_v30  ;;  %v553_v15 = vpop.f32.mrb[5].mxu0  ;;  %v3385_v54 = vld [vmem:[%s4612_s3 + $0x578] ss:$24 sps:$4 sm:$0xff]   ;;  %v3390_v59 = vld [vmem:[%s4612_s3 + $0x5a4] ss:$24 sps:$4 sm:$0xff]  }
 0x12a   :  { %v554_v38 = vadd.f32 %v2624_v30, %v553_v15  ;;  %v3194_v58 = vpop.f32.mrb[6].mxu0  ;;  %v3393_v49 = vld [vmem:[%s4612_s3 + $0x5ac] ss:$24 sps:$4 sm:$0xff]  }
 0x12b   :  { %v574_v6 = vmax.f32 %v562_v57, 0.0  ;;  %v565_v56 = vadd.f32 %v3194_v58, %v2624_v30  ;;  %v556_v33 = vpop.f32.mrb[7].mxu0  ;;  %v3396_v55 = vld [vmem:[%s4612_s3 + $0x5d4] ss:$24 sps:$4 sm:$0xff]   ;;  %v3397_v57 = vld [vmem:[%s4612_s3 + $0x5d8] ss:$24 sps:$4 sm:$0xff]  }
 0x12c   :  { %1780 = vmatpush1.bf16.msra.mxu1 %v3316_v50  ;;  %1866 = vmatpush1.bf16.msra.mxu0 %v3319_v51  ;;  %v572_v61 = vmax.f32 %v554_v38, 0.0  ;;  %v557_v18 = vadd.f32 %v2624_v30, %v556_v33  ;;  %v3363_v30 = vld [vmem:[%s4612_s3 + $0x4bc] ss:$24 sps:$4 sm:$0xff]   ;;  %v3388_v50 = vld [vmem:[%s4612_s3 + $0x5a0] ss:$24 sps:$4 sm:$0xff]  }
 0x12d   :  { %1781 = vmatprep.subr.bf16.mxu1 %v3324_v45  ;;  %1867 = vmatprep.subr.bf16.mxu0 %v3327_v23  ;;  %v575_v31 = vmax.f32 %v565_v56, 0.0  ;;  %v3391_v51 = vld [vmem:[%s4612_s3 + $0x5a8] ss:$24 sps:$4 sm:$0xff]   ;;  %v3399_v45 = vld [vmem:[%s4612_s3 + $0x5dc] ss:$24 sps:$4 sm:$0xff]  }
 0x12e   :  { %v573_v63 = vmax.f32 %v557_v18, 0.0  ;;  %v3394_v23 = vld [vmem:[%s4612_s3 + $0x5d0] ss:$24 sps:$4 sm:$0xff]   ;;  %v3402_v15 = vld [vmem:[%s4612_s3 + $0x14] ss:$24 sps:$4 sm:$0xff]   ;;  %v3496_v33 = vld [vmem:[%s4614_s4 + $0x40] sm:$0xff]  }
 0x12f   :  { %v4115_v0 = vpack.c.bf16 %v575_v31, %v574_v6  ;;  %v3400_v38 = vld [vmem:[%s4612_s3 + $0x10] ss:$24 sps:$4 sm:$0xff]   ;;  %v3405_v58 = vld [vmem:[%s4612_s3 + $0x44] ss:$24 sps:$4 sm:$0xff]   ;;  %v3403_v6 = vld [vmem:[%s4612_s3 + $0x40] ss:$24 sps:$4 sm:$0xff]  }
 0x130   :  { %1782 = vmatpush1.bf16.msra.mxu1 %v3322_v5  ;;  %1868 = vmatpush1.bf16.msra.mxu0 %v3325_v60  ;;  %v4123_v52 = vpack.c.bf16 %v573_v63, %v572_v61  ;;  %v3408_v56 = vld [vmem:[%s4612_s3 + $0x74] ss:$24 sps:$4 sm:$0xff]   ;;  %v3497_v5 = vld [vmem:[%s4614_s4] sm:$0xff]   ;;  %v3406_v60 = vld [vmem:[%s4612_s3 + $0x70] ss:$24 sps:$4 sm:$0xff]  }
 0x131   :  { %1783 = vmatprep.subr.bf16.mxu1 %v3330_v22  ;;  %1869 = vmatprep.subr.bf16.mxu0 %v3333_v47  ;;  %v3498_v61 = vld [vmem:[%s4614_s4 + $0x48] sm:$0xff]   ;;  %v3500_v18 = vld [vmem:[%s4614_s4 + $0x50] sm:$0xff]   ;;  %v3411_v22 = vld [vmem:[%s4612_s3 + $0xa4] ss:$24 sps:$4 sm:$0xff]  }
 0x132   :  { %1807 = vmatprep.mubr.bf16.mxu1 %v4115_v0  ;;  %1893 = vmatprep.mubr.bf16.mxu0 %v4115_v0  ;;  %v3409_v47 = vld [vmem:[%s4612_s3 + $0xa0] ss:$24 sps:$4 sm:$0xff]   ;;  %v3501_v31 = vld [vmem:[%s4614_s4 + $0x10] sm:$0xff]  }
 0x133   :  { %v3502_v63 = vld [vmem:[%s4614_s4 + $0x58] sm:$0xff]  }
 0x134   :  { %1784 = vmatpush1.bf16.msra.mxu1 %v3328_v46  ;;  %1870 = vmatpush1.bf16.msra.mxu0 %v3331_v25  ;;  %v3414_v46 = vld [vmem:[%s4612_s3 + $0xd4] ss:$24 sps:$4 sm:$0xff]   ;;  %v3412_v25 = vld [vmem:[%s4612_s3 + $0xd0] ss:$24 sps:$4 sm:$0xff]  }
 0x135   :  { %1785 = vmatprep.subr.bf16.mxu1 %v3336_v1  ;;  %1871 = vmatprep.subr.bf16.mxu0 %v3339_v2  ;;  %v3503_v1 = vld [vmem:[%s4614_s4 + $0x18] sm:$0xff]  }
 0x136   :  { %v3417_v2 = vld [vmem:[%s4612_s3 + $0x104] ss:$24 sps:$4 sm:$0xff]  }
 0x138   :  { %1786 = vmatpush1.bf16.msra.mxu1 %v3334_v3  ;;  %1872 = vmatpush1.bf16.msra.mxu0 %v3337_v8  ;;  %v3504_v3 = vld [vmem:[%s4614_s4 + $0x60] sm:$0xff]  }
 0x139   :  { %1787 = vmatprep.subr.bf16.mxu1 %v3342_v43  ;;  %1873 = vmatprep.subr.bf16.mxu0 %v3345_v9  ;;  %v3505_v8 = vld [vmem:[%s4614_s4 + $0x20] sm:$0xff]   ;;  %v3506_v9 = vld [vmem:[%s4614_s4 + $0x68] sm:$0xff]  }
 0x13a   :  { %v3415_v43 = vld [vmem:[%s4612_s3 + $0x100] ss:$24 sps:$4 sm:$0xff]  }
 0x13c   :  { %1788 = vmatpush1.bf16.msra.mxu1 %v3340_v10  ;;  %1874 = vmatpush1.bf16.msra.mxu0 %v3343_v11  ;;  %v3420_v10 = vld [vmem:[%s4612_s3 + $0x134] ss:$24 sps:$4 sm:$0xff]  }
 0x13d   :  { %1789 = vmatprep.subr.bf16.mxu1 %v3348_v16  ;;  %1875 = vmatprep.subr.bf16.mxu0 %v3351_v19  ;;  %v3507_v11 = vld [vmem:[%s4614_s4 + $0x28] sm:$0xff]   ;;  %v3423_v19 = vld [vmem:[%s4612_s3 + $0x164] ss:$24 sps:$4 sm:$0xff]  }
 0x13e   :  { %v3418_v16 = vld [vmem:[%s4612_s3 + $0x130] ss:$24 sps:$4 sm:$0xff]  }
 0x140   :  { %1790 = vmatpush1.bf16.msra.mxu1 %v3346_v48  ;;  %1876 = vmatpush1.bf16.msra.mxu0 %v3349_v20  ;;  %v3421_v48 = vld [vmem:[%s4612_s3 + $0x160] ss:$24 sps:$4 sm:$0xff]   ;;  %v3426_v20 = vld [vmem:[%s4612_s3 + $0x194] ss:$24 sps:$4 sm:$0xff]  }
 0x141   :  { %1791 = vmatprep.subr.bf16.mxu1 %v3354_v39  ;;  %1877 = vmatprep.subr.bf16.mxu0 %v3357_v21  ;;  %v3424_v39 = vld [vmem:[%s4612_s3 + $0x190] ss:$24 sps:$4 sm:$0xff]   ;;  %v3429_v21 = vld [vmem:[%s4612_s3 + $0x1c4] ss:$24 sps:$4 sm:$0xff]  }
 0x144   :  { %1792 = vmatpush1.bf16.msra.mxu1 %v3352_v53  ;;  %1878 = vmatpush1.bf16.msra.mxu0 %v3355_v26  ;;  %v3427_v53 = vld [vmem:[%s4612_s3 + $0x1c0] ss:$24 sps:$4 sm:$0xff]   ;;  %v3432_v26 = vld [vmem:[%s4612_s3 + $0x1f4] ss:$24 sps:$4 sm:$0xff]  }
 0x145   :  { %1793 = vmatprep.subr.bf16.mxu1 %v3360_v27  ;;  %1879 = vmatprep.subr.bf16.mxu0 %v3363_v30  ;;  %v3430_v27 = vld [vmem:[%s4612_s3 + $0x1f0] ss:$24 sps:$4 sm:$0xff]   ;;  %v3435_v30 = vld [vmem:[%s4612_s3 + $0x224] ss:$24 sps:$4 sm:$0xff]  }
 0x148   :  { %1794 = vmatpush1.bf16.msra.mxu1 %v3358_v32  ;;  %1880 = vmatpush1.bf16.msra.mxu0 %v3361_v17  ;;  %v3433_v32 = vld [vmem:[%s4612_s3 + $0x220] ss:$24 sps:$4 sm:$0xff]   ;;  %v3438_v17 = vld [vmem:[%s4612_s3 + $0x254] ss:$24 sps:$4 sm:$0xff]  }
 0x149   :  { %1795 = vmatprep.subr.bf16.mxu1 %v3366_v34  ;;  %1881 = vmatprep.subr.bf16.mxu0 %v3369_v35  ;;  %v3436_v34 = vld [vmem:[%s4612_s3 + $0x250] ss:$24 sps:$4 sm:$0xff]   ;;  %v3441_v35 = vld [vmem:[%s4612_s3 + $0x284] ss:$24 sps:$4 sm:$0xff]  }
 0x14c   :  { %1796 = vmatpush1.bf16.msra.mxu1 %v3364_v7  ;;  %1882 = vmatpush1.bf16.msra.mxu0 %v3367_v36  ;;  %v3439_v7 = vld [vmem:[%s4612_s3 + $0x280] ss:$24 sps:$4 sm:$0xff]   ;;  %v3444_v36 = vld [vmem:[%s4612_s3 + $0x2b4] ss:$24 sps:$4 sm:$0xff]  }
 0x14d   :  { %1797 = vmatprep.subr.bf16.mxu1 %v3372_v13  ;;  %1883 = vmatprep.subr.bf16.mxu0 %v3375_v37  ;;  %v3442_v13 = vld [vmem:[%s4612_s3 + $0x2b0] ss:$24 sps:$4 sm:$0xff]   ;;  %v3447_v37 = vld [vmem:[%s4612_s3 + $0x2e4] ss:$24 sps:$4 sm:$0xff]  }
 0x150   :  { %1798 = vmatpush1.bf16.msra.mxu1 %v3370_v62  ;;  %1884 = vmatpush1.bf16.msra.mxu0 %v3373_v40  ;;  %v3445_v62 = vld [vmem:[%s4612_s3 + $0x2e0] ss:$24 sps:$4 sm:$0xff]   ;;  %v3450_v40 = vld [vmem:[%s4612_s3 + $0x314] ss:$24 sps:$4 sm:$0xff]  }
 0x151   :  { %1799 = vmatprep.subr.bf16.mxu1 %v3378_v28  ;;  %1885 = vmatprep.subr.bf16.mxu0 %v3381_v4  ;;  %v3448_v28 = vld [vmem:[%s4612_s3 + $0x310] ss:$24 sps:$4 sm:$0xff]   ;;  %v3453_v4 = vld [vmem:[%s4612_s3 + $0x344] ss:$24 sps:$4 sm:$0xff]  }
 0x154   :  { %1800 = vmatpush1.bf16.msra.mxu1 %v3376_v24  ;;  %1886 = vmatpush1.bf16.msra.mxu0 %v3379_v14  ;;  %v3451_v24 = vld [vmem:[%s4612_s3 + $0x340] ss:$24 sps:$4 sm:$0xff]   ;;  %v3456_v14 = vld [vmem:[%s4612_s3 + $0x374] ss:$24 sps:$4 sm:$0xff]  }
 0x155   :  { %1801 = vmatprep.subr.bf16.mxu1 %v3384_v42  ;;  %1887 = vmatprep.subr.bf16.mxu0 %v3387_v44  ;;  %v3454_v42 = vld [vmem:[%s4612_s3 + $0x370] ss:$24 sps:$4 sm:$0xff]   ;;  %v3462_v44 = vld [vmem:[%s4612_s3 + $0x3d4] ss:$24 sps:$4 sm:$0xff]  }
 0x158   :  { %1802 = vmatpush1.bf16.msra.mxu1 %v3382_v29  ;;  %1888 = vmatpush1.bf16.msra.mxu0 %v3385_v54  ;;  %v3460_v29 = vld [vmem:[%s4612_s3 + $0x3d0] ss:$24 sps:$4 sm:$0xff]   ;;  %v3465_v54 = vld [vmem:[%s4612_s3 + $0x404] ss:$24 sps:$4 sm:$0xff]  }
 0x159   :  { %1803 = vmatprep.subr.bf16.mxu1 %v3390_v59  ;;  %1889 = vmatprep.subr.bf16.mxu0 %v3393_v49  ;;  %v3463_v59 = vld [vmem:[%s4612_s3 + $0x400] ss:$24 sps:$4 sm:$0xff]   ;;  %v3508_v49 = vld [vmem:[%s4614_s4 + $0x70] sm:$0xff]  }
 0x15c   :  { %1804 = vmatpush1.bf16.msra.mxu1 %v3388_v50  ;;  %1890 = vmatpush1.bf16.msra.mxu0 %v3391_v51  ;;  %v3468_v50 = vld [vmem:[%s4612_s3 + $0x434] ss:$24 sps:$4 sm:$0xff]  }
 0x15d   :  { %1805 = vmatprep.subr.bf16.mxu1 %v3396_v55  ;;  %1891 = vmatprep.subr.bf16.mxu0 %v3399_v45  ;;  %v3509_v51 = vld [vmem:[%s4614_s4 + $0x30] sm:$0xff]   ;;  %v3510_v45 = vld [vmem:[%s4614_s4 + $0x78] sm:$0xff]  }
 0x15e   :  { %v3466_v55 = vld [vmem:[%s4612_s3 + $0x430] ss:$24 sps:$4 sm:$0xff]  }
 0x160   :  { %1806 = vmatpush1.bf16.msra.mxu1 %v3394_v23  ;;  %1892 = vmatpush1.bf16.msra.mxu0 %v3397_v57  ;;  %v3471_v23 = vld [vmem:[%s4612_s3 + $0x464] ss:$24 sps:$4 sm:$0xff]  }
 0x161   :  { %1904 = vmatprep.subr.bf16.mxu1 %v3402_v15  ;;  %3119 = vmatprep.subr.bf16.mxu0 %v3496_v33  ;;  %v3511_v57 = vld [vmem:[%s4614_s4 + $0x38] sm:$0xff]  }
 0x162   :  { %v3469_v15 = vld [vmem:[%s4612_s3 + $0x460] ss:$24 sps:$4 sm:$0xff]  }
 0x163   :  { %1808 = vmatmul.mubr.bf16.vlgmr.msra.gmra.mrb[0].mxu1 %v4123_v52  ;;  %1894 = vmatmul.mubr.bf16.vlgmr.msra.gmra.mrb[8].mxu0 %v4123_v52  ;;  %v3475_v33 = vld [vmem:[%s4612_s3 + $0x4c0] ss:$24 sps:$4 sm:$0xff]  }
 0x164   :  { %1905 = vmatpush1.bf16.msra.mxu1 %v3400_v38  ;;  %1936 = vmatprep.mubr.bf16.mxu1 %v4059_v12  ;;  %v3499_v12 = vld [vmem:[%s4614_s4 + $0x8] sm:$0xff]   ;;  %v3512_v38 = vld [vmem:[%s4614_s4 + $0xc0] sm:$0xff]  }
 0x165   :  { %1906 = vmatprep.subr.bf16.mxu1 %v3405_v58  ;;  %3120 = vmatpush3.bf16.msra.mxu0 %v3497_v5  ;;  %v3474_v58 = vld [vmem:[%s4612_s3 + $0x494] ss:$24 sps:$4 sm:$0xff]  }
 0x166   :  { %3121 = vmatprep.subr.bf16.mxu0 %v3498_v61  ;;  %v3480_v5 = vld [vmem:[%s4612_s3 + $0x4f4] ss:$24 sps:$4 sm:$0xff]   ;;  %v3483_v61 = vld [vmem:[%s4612_s3 + $0x524] ss:$24 sps:$4 sm:$0xff]  }
 0x168   :  { %1907 = vmatpush1.bf16.msra.mxu1 %v3403_v6  ;;  %v3472_v6 = vld [vmem:[%s4612_s3 + $0x490] ss:$24 sps:$4 sm:$0xff]  }
 0x169   :  { %1908 = vmatprep.subr.bf16.mxu1 %v3408_v56  ;;  %3122 = vmatpush3.bf16.msra.mxu0 %v3499_v12  ;;  %v3477_v56 = vld [vmem:[%s4612_s3 + $0x4c4] ss:$24 sps:$4 sm:$0xff]   ;;  %v3481_v12 = vld [vmem:[%s4612_s3 + $0x520] ss:$24 sps:$4 sm:$0xff]  }
 0x16a   :  { %3123 = vmatprep.subr.bf16.mxu0 %v3500_v18  ;;  %v3486_v18 = vld [vmem:[%s4612_s3 + $0x554] ss:$24 sps:$4 sm:$0xff]  }
 0x16c   :  { %1909 = vmatpush1.bf16.msra.mxu1 %v3406_v60  ;;  %v3478_v60 = vld [vmem:[%s4612_s3 + $0x4f0] ss:$24 sps:$4 sm:$0xff]  }
 0x16d   :  { %1910 = vmatprep.subr.bf16.mxu1 %v3411_v22  ;;  %3124 = vmatpush3.bf16.msra.mxu0 %v3501_v31  ;;  %v3484_v22 = vld [vmem:[%s4612_s3 + $0x550] ss:$24 sps:$4 sm:$0xff]   ;;  %v3487_v31 = vld [vmem:[%s4612_s3 + $0x580] ss:$24 sps:$4 sm:$0xff]  }
 0x16e   :  { %3125 = vmatprep.subr.bf16.mxu0 %v3502_v63  ;;  %v3492_v63 = vld [vmem:[%s4612_s3 + $0x5b4] ss:$24 sps:$4 sm:$0xff]  }
 0x170   :  { %1911 = vmatpush1.bf16.msra.mxu1 %v3409_v47  ;;  %v3489_v47 = vld [vmem:[%s4612_s3 + $0x584] ss:$24 sps:$4 sm:$0xff]  }
 0x171   :  { %1912 = vmatprep.subr.bf16.mxu1 %v3414_v46  ;;  %3126 = vmatpush3.bf16.msra.mxu0 %v3503_v1  ;;  %v3490_v46 = vld [vmem:[%s4612_s3 + $0x5b0] ss:$24 sps:$4 sm:$0xff]   ;;  %v3493_v1 = vld [vmem:[%s4612_s3 + $0x5e0] ss:$24 sps:$4 sm:$0xff]  }
 0x172   :  { %3127 = vmatprep.subr.bf16.mxu0 %v3504_v3 }
 0x174   :  { %1913 = vmatpush1.bf16.msra.mxu1 %v3412_v25  ;;  %v3495_v25 = vld [vmem:[%s4612_s3 + $0x5e4] ss:$24 sps:$4 sm:$0xff]  }
 0x175   :  { %1914 = vmatprep.subr.bf16.mxu1 %v3417_v2  ;;  %3128 = vmatpush3.bf16.msra.mxu0 %v3505_v8 }
 0x176   :  { %3129 = vmatprep.subr.bf16.mxu0 %v3506_v9 }
 0x178   :  { %1915 = vmatpush1.bf16.msra.mxu1 %v3415_v43 }
 0x179   :  { %1916 = vmatprep.subr.bf16.mxu1 %v3420_v10  ;;  %3130 = vmatpush3.bf16.msra.mxu0 %v3507_v11 }
 0x17a   :  { %3131 = vmatprep.subr.bf16.mxu0 %v3508_v49  ;;  %v3532_v49 = vld [vmem:[%s4614_s4 + $0x150] sm:$0xff]  }
 0x17c   :  { %1917 = vmatpush1.bf16.msra.mxu1 %v3418_v16 }
 0x17d   :  { %1918 = vmatprep.subr.bf16.mxu1 %v3423_v19  ;;  %3132 = vmatpush3.bf16.msra.mxu0 %v3509_v51  ;;  %v3534_v51 = vld [vmem:[%s4614_s4 + $0x158] sm:$0xff]  }
 0x17e   :  { %3133 = vmatprep.subr.bf16.mxu0 %v3510_v45  ;;  %v3536_v45 = vld [vmem:[%s4614_s4 + $0x160] sm:$0xff]  }
 0x180   :  { %1919 = vmatpush1.bf16.msra.mxu1 %v3421_v48 }
 0x181   :  { %1920 = vmatprep.subr.bf16.mxu1 %v3426_v20  ;;  %3134 = vmatpush3.bf16.msra.mxu0 %v3511_v57  ;;  %v3538_v57 = vld [vmem:[%s4614_s4 + $0x168] sm:$0xff]  }
 0x182   :  { %3141 = vmatprep.subr.bf16.mxu0 %v3512_v38  ;;  %v3540_v38 = vld [vmem:[%s4614_s4 + $0x170] sm:$0xff]  }
 0x184   :  { %1921 = vmatpush1.bf16.msra.mxu1 %v3424_v39 }
 0x185   :  { %1922 = vmatprep.subr.bf16.mxu1 %v3429_v21 }
 0x188   :  { %1923 = vmatpush1.bf16.msra.mxu1 %v3427_v53 }
 0x189   :  { %1924 = vmatprep.subr.bf16.mxu1 %v3432_v26 }
 0x18c   :  { %1925 = vmatpush1.bf16.msra.mxu1 %v3430_v27 }
 0x18d   :  { %1926 = vmatprep.subr.bf16.mxu1 %v3435_v30 }
 0x190   :  { %1927 = vmatpush1.bf16.msra.mxu1 %v3433_v32 }
 0x191   :  { %1928 = vmatprep.subr.bf16.mxu1 %v3438_v17 }
 0x194   :  { %1929 = vmatpush1.bf16.msra.mxu1 %v3436_v34  ;;  %v3513_v34 = vld [vmem:[%s4614_s4 + $0x80] sm:$0xff]  }
 0x195   :  { %1930 = vmatprep.subr.bf16.mxu1 %v3441_v35  ;;  %v3514_v35 = vld [vmem:[%s4614_s4 + $0xc8] sm:$0xff]  }
 0x198   :  { %1931 = vmatpush1.bf16.msra.mxu1 %v3439_v7  ;;  %v3515_v7 = vld [vmem:[%s4614_s4 + $0x88] sm:$0xff]  }
 0x199   :  { %1932 = vmatprep.subr.bf16.mxu1 %v3444_v36  ;;  %v3516_v36 = vld [vmem:[%s4614_s4 + $0xd0] sm:$0xff]  }
 0x19c   :  { %1933 = vmatpush1.bf16.msra.mxu1 %v3442_v13  ;;  %v3517_v13 = vld [vmem:[%s4614_s4 + $0x90] sm:$0xff]  }
 0x19d   :  { %1934 = vmatprep.subr.bf16.mxu1 %v3447_v37  ;;  %v3518_v37 = vld [vmem:[%s4614_s4 + $0xd8] sm:$0xff]  }
 0x1a0   :  { %1935 = vmatpush1.bf16.msra.mxu1 %v3445_v62  ;;  %v3519_v62 = vld [vmem:[%s4614_s4 + $0x98] sm:$0xff]  }
 0x1a1   :  { %1947 = vmatprep.subr.bf16.mxu1 %v3450_v40  ;;  %v3520_v40 = vld [vmem:[%s4614_s4 + $0xe0] sm:$0xff]  }
 0x1a3   :  { %1937 = vmatmul.mubr.bf16.vlgmr.msra.gmra.mrb[4].mxu1 %v4067_v41  ;;  %v3459_v41 = vld [vmem:[%s4612_s3 + $0x3a4] ss:$24 sps:$4 sm:$0xff]  }
 0x1a4   :  { %1948 = vmatpush1.bf16.msra.mxu1 %v3448_v28  ;;  %1979 = vmatprep.mubr.bf16.mxu1 %v4115_v0  ;;  %v3457_v0 = vld [vmem:[%s4612_s3 + $0x3a0] ss:$24 sps:$4 sm:$0xff]  }
 0x1a5   :  { %1949 = vmatprep.subr.bf16.mxu1 %v3453_v4  ;;  %v3521_v28 = vld [vmem:[%s4614_s4 + $0xa0] sm:$0xff]   ;;  %v3522_v4 = vld [vmem:[%s4614_s4 + $0xe8] sm:$0xff]  }
 0x1a8   :  { %1950 = vmatpush1.bf16.msra.mxu1 %v3451_v24  ;;  %v3523_v24 = vld [vmem:[%s4614_s4 + $0xa8] sm:$0xff]  }
 0x1a9   :  { %1951 = vmatprep.subr.bf16.mxu1 %v3456_v14  ;;  %v3524_v14 = vld [vmem:[%s4614_s4 + $0xf0] sm:$0xff]  }
 0x1ac   :  { %1952 = vmatpush1.bf16.msra.mxu1 %v3454_v42  ;;  %v3525_v42 = vld [vmem:[%s4614_s4 + $0xb0] sm:$0xff]  }
 0x1ad   :  { %1953 = vmatprep.subr.bf16.mxu1 %v3459_v41  ;;  %v3526_v41 = vld [vmem:[%s4614_s4 + $0xf8] sm:$0xff]  }
 0x1b0   :  { %1954 = vmatpush1.bf16.msra.mxu1 %v3457_v0  ;;  %v3527_v0 = vld [vmem:[%s4614_s4 + $0xb8] sm:$0xff]  }
 0x1b1   :  { %1955 = vmatprep.subr.bf16.mxu1 %v3462_v44  ;;  %v3528_v44 = vld [vmem:[%s4614_s4 + $0x140] sm:$0xff]  }
 0x1b4   :  { %1956 = vmatpush1.bf16.msra.mxu1 %v3460_v29  ;;  %v3529_v29 = vld [vmem:[%s4614_s4 + $0x100] sm:$0xff]  }
 0x1b5   :  { %1957 = vmatprep.subr.bf16.mxu1 %v3465_v54  ;;  %v3530_v54 = vld [vmem:[%s4614_s4 + $0x148] sm:$0xff]  }
 0x1b8   :  { %1958 = vmatpush1.bf16.msra.mxu1 %v3463_v59  ;;  %v3531_v59 = vld [vmem:[%s4614_s4 + $0x108] sm:$0xff]  }
 0x1b9   :  { %1959 = vmatprep.subr.bf16.mxu1 %v3468_v50  ;;  %v3533_v50 = vld [vmem:[%s4614_s4 + $0x110] sm:$0xff]  }
 0x1bc   :  { %1960 = vmatpush1.bf16.msra.mxu1 %v3466_v55  ;;  %v3535_v55 = vld [vmem:[%s4614_s4 + $0x118] sm:$0xff]  }
 0x1bd   :  { %1961 = vmatprep.subr.bf16.mxu1 %v3471_v23  ;;  %v3537_v23 = vld [vmem:[%s4614_s4 + $0x120] sm:$0xff]  }
 0x1c0   :  { %1962 = vmatpush1.bf16.msra.mxu1 %v3469_v15  ;;  %v3539_v15 = vld [vmem:[%s4614_s4 + $0x128] sm:$0xff]  }
 0x1c1   :  { %1963 = vmatprep.subr.bf16.mxu1 %v3474_v58  ;;  %v3541_v58 = vld [vmem:[%s4614_s4 + $0x130] sm:$0xff]  }
 0x1c4   :  { %1964 = vmatpush1.bf16.msra.mxu1 %v3472_v6  ;;  %v3542_v6 = vld [vmem:[%s4614_s4 + $0x178] sm:$0xff]  }
 0x1c5   :  { %1965 = vmatprep.subr.bf16.mxu1 %v3477_v56  ;;  %v3543_v56 = vld [vmem:[%s4614_s4 + $0x138] sm:$0xff]  }
 0x1c8   :  { %1966 = vmatpush1.bf16.msra.mxu1 %v3475_v33 }
 0x1c9   :  { %1967 = vmatprep.subr.bf16.mxu1 %v3480_v5 }
 0x1cc   :  { %1968 = vmatpush1.bf16.msra.mxu1 %v3478_v60 }
 0x1cd   :  { %1969 = vmatprep.subr.bf16.mxu1 %v3483_v61 }
 0x1d0   :  { %1970 = vmatpush1.bf16.msra.mxu1 %v3481_v12 }
 0x1d1   :  { %1971 = vmatprep.subr.bf16.mxu1 %v3486_v18 }
 0x1d4   :  { %1972 = vmatpush1.bf16.msra.mxu1 %v3484_v22 }
 0x1d5   :  { %1973 = vmatprep.subr.bf16.mxu1 %v3489_v47 }
 0x1d8   :  { %1974 = vmatpush1.bf16.msra.mxu1 %v3487_v31 }
 0x1d9   :  { %1975 = vmatprep.subr.bf16.mxu1 %v3492_v63 }
 0x1dc   :  { %1976 = vmatpush1.bf16.msra.mxu1 %v3490_v46 }
 0x1dd   :  { %1977 = vmatprep.subr.bf16.mxu1 %v3495_v25 }
 0x1e0   :  { %1978 = vmatpush1.bf16.msra.mxu1 %v3493_v1 }
 0x1e3   :  { %1980 = vmatmul.mubr.bf16.vlgmr.msra.gmra.mrb[4].mxu1 %v4123_v52 }
 0x236   :  { %v1809_v2 = vpop.f32.mrb[0].mxu1  ;;  %v1895_v3 = vpop.f32.mrb[8].mxu0 }
 0x237   :  { %v1811_v8 = vpop.f32.mrb[1].mxu1  ;;  %v1897_v43 = vpop.f32.mrb[9].mxu0  ;;  %v1990_v11 = vmax.f32 %v1809_v2, 0.0  ;;  %v1992_v16 = vmax.f32 %v1895_v3, 0.0 }
 0x238   :  { %v1813_v9 = vpop.f32.mrb[2].mxu1  ;;  %v1899_v10 = vpop.f32.mrb[10].mxu0  ;;  %v1991_v21 = vmax.f32 %v1811_v8, 0.0  ;;  %v1993_v53 = vmax.f32 %v1897_v43, 0.0  ;;  %v2821_v43 = vld [vmem:[%s4615_s5] ss:$0 sm:$0xff] }
 0x239   :  { %v1996_v19 = vmax.f32 %v1813_v9, 0.0  ;;  %v1998_v48 = vmax.f32 %v1899_v10, 0.0  ;;  %v1815_v20 = vpop.f32.mrb[3].mxu1  ;;  %v1901_v39 = vpop.f32.mrb[11].mxu0 }
 0x23a   :  { %v1997_v26 = vmax.f32 %v1815_v20, 0.0  ;;  %v1999_v27 = vmax.f32 %v1901_v39, 0.0 }
 0x23b   :  { %v2002_v30 = vpack.c.bf16 %v1996_v19, %v1990_v11  ;;  %v2004_v32 = vpack.c.bf16 %v1998_v48, %v1992_v16 }
 0x23c   :  { %v2003_v17 = vpack.c.bf16 %v1997_v26, %v1991_v21  ;;  %v2005_v52 = vpack.c.bf16 %v1999_v27, %v1993_v53 }
 0x23e   :  { %2431 = vmatprep.mubr.bf16.mxu0 %v2003_v17 }
 0x23f   :  { %2432 = vmatmul.mubr.bf16.vlgmr.msra.gmra.mrb[12].mxu0 %v2002_v30 }
 0x240   :  { %3142 = vmatpush3.bf16.msra.mxu0 %v3513_v34  ;;  %2472 = vmatprep.mubr.bf16.mxu0 %v2005_v52 }
 0x241   :  { %3143 = vmatprep.subr.bf16.mxu0 %v3514_v35 }
 0x244   :  { %3144 = vmatpush3.bf16.msra.mxu0 %v3515_v7 }
 0x245   :  { %3145 = vmatprep.subr.bf16.mxu0 %v3516_v36 }
 0x248   :  { %3146 = vmatpush3.bf16.msra.mxu0 %v3517_v13 }
 0x249   :  { %3147 = vmatprep.subr.bf16.mxu0 %v3518_v37 }
 0x24c   :  { %3148 = vmatpush3.bf16.msra.mxu0 %v3519_v62 }
 0x24d   :  { %3149 = vmatprep.subr.bf16.mxu0 %v3520_v40 }
 0x250   :  { %3150 = vmatpush3.bf16.msra.mxu0 %v3521_v28 }
 0x251   :  { %3151 = vmatprep.subr.bf16.mxu0 %v3522_v4 }
 0x254   :  { %3152 = vmatpush3.bf16.msra.mxu0 %v3523_v24 }
 0x255   :  { %3153 = vmatprep.subr.bf16.mxu0 %v3524_v14 }
 0x258   :  { %3154 = vmatpush3.bf16.msra.mxu0 %v3525_v42 }
 0x259   :  { %3155 = vmatprep.subr.bf16.mxu0 %v3526_v41 }
 0x25c   :  { %3156 = vmatpush3.bf16.msra.mxu0 %v3527_v0 }
 0x25d   :  { %3163 = vmatprep.subr.bf16.mxu0 %v3528_v44 }
 0x25f   :  { %2473 = vmatmul.mubr.bf16.vlgmr.msra.gmra.mrb[16].mxu0 %v2004_v32 }
 0x260   :  { %3164 = vmatpush3.bf16.msra.mxu0 %v3529_v29 }
 0x261   :  { %3165 = vmatprep.subr.bf16.mxu0 %v3530_v54 }
 0x264   :  { %3166 = vmatpush3.bf16.msra.mxu0 %v3531_v59 }
 0x265   :  { %3167 = vmatprep.subr.bf16.mxu0 %v3532_v49 }
 0x268   :  { %3168 = vmatpush3.bf16.msra.mxu0 %v3533_v50 }
 0x269   :  { %3169 = vmatprep.subr.bf16.mxu0 %v3534_v51 }
 0x26c   :  { %3170 = vmatpush3.bf16.msra.mxu0 %v3535_v55 }
 0x26d   :  { %3171 = vmatprep.subr.bf16.mxu0 %v3536_v45 }
 0x270   :  { %3172 = vmatpush3.bf16.msra.mxu0 %v3537_v23 }
 0x271   :  { %3173 = vmatprep.subr.bf16.mxu0 %v3538_v57 }
 0x274   :  { %3174 = vmatpush3.bf16.msra.mxu0 %v3539_v15 }
 0x275   :  { %3175 = vmatprep.subr.bf16.mxu0 %v3540_v38 }
 0x278   :  { %3176 = vmatpush3.bf16.msra.mxu0 %v3541_v58 }
 0x279   :  { %3177 = vmatprep.subr.bf16.mxu0 %v3542_v6 }
 0x27c   :  { %3178 = vmatpush3.bf16.msra.mxu0 %v3543_v56 }
 0x2b6   :  { %v1981_v33 = vpop.f32.mrb[4].mxu1 }
 0x2b7   :  { %v1983_v5 = vpop.f32.mrb[5].mxu1  ;;  %v1994_v61 = vmax.f32 %v1981_v33, 0.0 }
 0x2b8   :  { %v1985_v60 = vpop.f32.mrb[6].mxu1  ;;  %v1995_v22 = vmax.f32 %v1983_v5, 0.0 }
 0x2b9   :  { %v2000_v12 = vmax.f32 %v1985_v60, 0.0  ;;  %v1987_v18 = vpop.f32.mrb[7].mxu1 }
 0x2ba   :  { %v2001_v47 = vmax.f32 %v1987_v18, 0.0 }
 0x2bb   :  { %v2006_v31 = vpack.c.bf16 %v2000_v12, %v1994_v61 }
 0x2bc   :  { %v2007_v63 = vpack.c.bf16 %v2001_v47, %v1995_v22 }
 0x2be   :  { %2513 = vmatprep.mubr.bf16.mxu0 %v2007_v63 }
 0x2bf   :  { %2514 = vmatmul.mubr.bf16.vlgmr.msra.gmra.mrb[20].mxu0 %v2006_v31 }
 0x312   :  { %v3135_v46 = vpop.f32.mrb[12].mxu0 }
 0x313   :  { %v3136_v25 = vpop.f32.mrb[13].mxu0 }
 0x314   :  { %v3137_v1 = vadd.f32 %v3136_v25, %v3135_v46  ;;  %v3138_v2 = vpop.f32.mrb[14].mxu0 }
 0x315   :  { %v3139_v3 = vpop.f32.mrb[15].mxu0 }
 0x316   :  { %v3140_v8 = vadd.f32 %v3139_v3, %v3138_v2  ;;  %v2434_v11 = vadd.f32 %v3137_v1, %v2821_v43 }
 0x318   :  { %v2437_v20 = vadd.f32 %v3140_v8, %v2821_v43 }
 0x332   :  { %v3157_v9 = vpop.f32.mrb[16].mxu0 }
 0x333   :  { %v3158_v10 = vpop.f32.mrb[17].mxu0 }
 0x334   :  { %v3159_v16 = vadd.f32 %v3158_v10, %v3157_v9  ;;  %v3160_v19 = vpop.f32.mrb[18].mxu0 }
 0x335   :  { %v3161_v48 = vpop.f32.mrb[19].mxu0 }
 0x336   :  { %v2475_v39 = vadd.f32 %v3159_v16, %v2434_v11  ;;  %v3162_v21 = vadd.f32 %v3161_v48, %v3160_v19 }
 0x338   :  { %v2478_v53 = vadd.f32 %v3162_v21, %v2437_v20 }
 0x392   :  { %v3179_v26 = vpop.f32.mrb[20].mxu0 }
 0x393   :  { %v3180_v27 = vpop.f32.mrb[21].mxu0 }
 0x394   :  { %v3181_v30 = vadd.f32 %v3180_v27, %v3179_v26  ;;  %v3182_v32 = vpop.f32.mrb[22].mxu0 }
 0x395   :  { %v3183_v17 = vpop.f32.mrb[23].mxu0 }
 0x396   :  { %v2516_v52 = vadd.f32 %v3181_v30, %v2475_v39  ;;  %v3184_v34 = vadd.f32 %v3183_v17, %v3182_v32 }
 0x398   :  { %2522 = vst [vmem:[%s4616_s6] sm:$0xff] %v2516_v52  ;;  %v2519_v35 = vadd.f32 %v3184_v34, %v2478_v53 }
 0x39a   :  { %2523 = vst [vmem:[%s4616_s6 + $0x8] sm:$0xff] %v2519_v35 }

</bundles_post_ra>
